<compile_context>
chip_gen: v7x
topology: tpu7x:2x2x1
jax: 0.10.0
libtpu: 0.0.40
codegen_flags: <defaults>
</compile_context>

<pallas_src>
import functools

import jax
import jax.numpy as jnp
from jax.experimental import pallas as pl
from jax.experimental.pallas import tpu as pltpu

_LANES = 128                      # vreg lane width (fast axis)
_MIN_PALLAS_BYTES = 256 * 1024    # below this, pallas_call launch overhead loses


def _sublane_multiple(dtype) -> int:
    """Native packed vreg sublane tile: 8 (4B), 16 (2B), 32 (1B) rows."""
    return max(8, 32 // jnp.dtype(dtype).itemsize)


@functools.lru_cache(maxsize=1)
def _tpu_config():
    """Per-generation tuning: (max_block_bytes, vmem_limit_bytes, multi_tc)."""
    try:
        kind = jax.devices()[0].device_kind.lower()
    except Exception:
        kind = ""
    if "v7" in kind:
        # 3.2 TB/s per-TC HBM: 8 MiB blocks amortize the ~0.35us/step overhead.
        # 8 MiB x 2 bufs x (in + out) = 32 MiB -> raise scoped VMEM explicitly.
        return 8 * 1024 * 1024, 48 * 1024 * 1024, True
    if "v6" in kind:
        # 4 MiB blocks -> 16 MiB double-buffered total, inside the 32 MiB default.
        return 4 * 1024 * 1024, None, False
    if "v5e" in kind or "v5 lite" in kind or "v5lite" in kind:
        # ~820 GB/s: 2 MiB blocks already ~7% overhead; keep default scoped VMEM.
        return 2 * 1024 * 1024, None, False
    # Unknown chip: conservative defaults (safe under every default VMEM limit).
    return 2 * 1024 * 1024, None, False


def _scale_kernel(scale_ref, x_ref, o_ref):
    # scale_ref: SMEM (1,) f32 scalar; x_ref/o_ref: VMEM (block_rows, 128) tiles.
    s = scale_ref[0]
    o_ref[...] = x_ref[...].astype(o_ref.dtype) * s.astype(o_ref.dtype)


def scale_forward(x: jax.Array, scale: jax.Array, *,
                  out_dtype=None, donate_input: bool = False) -> jax.Array:
    """Compute x * scale with a Pallas hot path.

    out_dtype=None follows PyTorch promotion (bf16 * f32 param -> f32); pass
    e.g. out_dtype=jnp.bfloat16 to keep bf16 outputs and cut HBM traffic.
    donate_input=True aliases the input buffer to the output (only applied
    when the input dtype already equals the output dtype).
    """
    scale = jnp.asarray(scale, dtype=jnp.float32).reshape(())
    if out_dtype is None:
        out_dtype = jnp.result_type(x.dtype, scale.dtype)  # PyTorch promotion
    out_dtype = jnp.dtype(out_dtype)

    n = x.size
    nbytes = n * x.dtype.itemsize
    # Dtype-aware sublane multiple: respect the packed native tile of both the
    # input and the output dtype (LCM is just the max of the two powers of 2).
    sub = max(_sublane_multiple(x.dtype), _sublane_multiple(out_dtype))
    chunk = sub * _LANES

    # Small or oddly-sized inputs: plain JAX (XLA fuses this near roofline;
    # also avoids any padding copy for totals not a multiple of sub*128).
    if nbytes < _MIN_PALLAS_BYTES or n % chunk != 0:
        return x.astype(out_dtype) * scale.astype(out_dtype)

    rows = n // _LANES                      # multiple of `sub` by construction
    x2d = x.reshape(rows, _LANES)           # free reshape, no copy

    max_block_bytes, vmem_limit, multi_tc = _tpu_config()
    buf_itemsize = max(x.dtype.itemsize, out_dtype.itemsize)
    max_block_rows = max(
        sub, (max_block_bytes // (_LANES * buf_itemsize)) // sub * sub)

    # Balanced blocks: avoid a (4096-row, 8-row)-style split. Round the
    # per-block row count up to the dtype-aware sublane multiple.
    num_blocks = pl.cdiv(rows, max_block_rows)
    if multi_tc and num_blocks == 1 and rows >= 2 * sub:
        # Only on multi-TensorCore chips (v7x): give each TC a block.
        num_blocks = 2
    block_rows = pl.cdiv(pl.cdiv(rows, num_blocks), sub) * sub
    grid = (pl.cdiv(rows, block_rows),)

    extra_kwargs = {}
    if donate_input and x.dtype == out_dtype:
        # inputs: (scale, x2d) -> alias x2d (index 1) to output 0.
        extra_kwargs["input_output_aliases"] = {1: 0}

    compiler_kwargs = dict(dimension_semantics=("parallel",))
    if vmem_limit is not None:
        compiler_kwargs["vmem_limit_bytes"] = vmem_limit

    out2d = pl.pallas_call(
        _scale_kernel,
        out_shape=jax.ShapeDtypeStruct((rows, _LANES), out_dtype),
        grid=grid,
        in_specs=[
            pl.BlockSpec(memory_space=pltpu.MemorySpace.SMEM),  # scalar param
            pl.BlockSpec((block_rows, _LANES), lambda i: (i, 0)),
        ],
        out_specs=pl.BlockSpec((block_rows, _LANES), lambda i: (i, 0)),
        compiler_params=pltpu.CompilerParams(**compiler_kwargs),
        **extra_kwargs,
    )(scale.reshape(1), x2d)

    return out2d.reshape(x.shape)


class Scale:
    """JAX mirror of the PyTorch Scale module (learnable scalar multiply)."""

    def __init__(self, init_value: float = 1.0):
        # Deterministic parameter init (matches nn.Parameter(tensor(init_value))).
        self.scale = jnp.asarray(init_value, dtype=jnp.float32)

    def __call__(self, x: jax.Array) -> jax.Array:
        return scale_forward(x, self.scale)


if __name__ == "__main__":
    key = jax.random.PRNGKey(0)
    k1, k2, k3, k4 = jax.random.split(key, 4)
    module = Scale(init_value=1.5)

    # 1) Small NCHW-style input (2, 4, 16, 16): plain-JAX fast path (tiny tensor).
    x_small = jax.random.normal(k1, (2, 4, 16, 16), dtype=jnp.float32)
    out_small = jax.block_until_ready(module(x_small))
    assert out_small.shape == x_small.shape and out_small.dtype == jnp.float32
    assert jnp.allclose(out_small, x_small * jnp.float32(1.5), atol=1e-6, rtol=1e-6)

    # 2) Medium input exercising the Pallas path with balanced blocks
    #    (rows = 4104 -> two ~2k-row blocks instead of 4096 + 8).
    x_med = jax.random.normal(k2, (3, 171, 1024), dtype=jnp.float32)
    out_med = jax.block_until_ready(module(x_med))
    assert out_med.shape == x_med.shape and out_med.dtype == jnp.float32
    assert jnp.allclose(out_med, x_med * jnp.float32(1.5), atol=1e-6, rtol=1e-6)

    # 3) Larger input: multi-block grid on the Pallas path.
    x_big = jax.random.normal(k3, (2, 4, 1024, 128), dtype=jnp.float32)
    out_big = jax.block_until_ready(module(x_big))
    assert jnp.allclose(out_big, x_big * jnp.float32(1.5), atol=1e-6, rtol=1e-6)

    # 4) bf16 activations, default PyTorch-style promotion -> f32 output.
    x_bf16 = jax.random.normal(k4, (2, 4, 512, 128), dtype=jnp.bfloat16)
    out_bf16 = jax.block_until_ready(module(x_bf16))
    assert out_bf16.dtype == jnp.float32
    assert jnp.allclose(out_bf16, x_bf16.astype(jnp.float32) * jnp.float32(1.5),
                        atol=1e-5, rtol=1e-5)

    # 4b) bf16 activations with out_dtype override -> bf16 output (less HBM traffic).
    out_bf16_keep = jax.block_until_ready(
        scale_forward(x_bf16, module.scale, out_dtype=jnp.bfloat16))
    assert out_bf16_keep.dtype == jnp.bfloat16
    assert jnp.allclose(out_bf16_keep.astype(jnp.float32),
                        x_bf16.astype(jnp.float32) * jnp.float32(1.5),
                        atol=2e-2, rtol=2e-2)

    # 5) In-place variant (input_output_aliases) under jit with a donated buffer.
    x_donate = x_big + 0.0  # fresh buffer that is safe to donate
    fwd_inplace = jax.jit(
        lambda a, s: scale_forward(a, s, donate_input=True),
        donate_argnums=(0,),
    )
    out_ip = jax.block_until_ready(fwd_inplace(x_donate, module.scale))
    assert jnp.allclose(out_ip, x_big * jnp.float32(1.5), atol=1e-6, rtol=1e-6)

    print("KERNEL_OK")
</pallas_src>

<mosaic_0001>
module attributes {stable_mosaic.version = 11 : i64} {
  func.func @_scale_kernel(%arg0: i32, %arg1: memref<1xf32, #tpu.memory_space<smem>>, %arg2: memref<2056x128xf32, #tpu.memory_space<vmem>>, %arg3: memref<2056x128xf32, #tpu.memory_space<vmem>>) attributes {dimension_semantics = [#tpu.dimension_semantics<parallel>], iteration_bounds = array<i64: 2>, scalar_prefetch = 0 : i64, scratch_operands = 0 : i64, tpu.core_type = #tpu.core_type<tc>, window_params = [{transform_indices = @transform_0, window_bounds = array<i64: 1>}, {transform_indices = @transform_1, window_bounds = array<i64: 2056, 128>}, {transform_indices = @transform_2, window_bounds = array<i64: 2056, 128>}]} {
    %c0 = arith.constant 0 : index
    %0 = memref.load %arg1[%c0] : memref<1xf32, #tpu.memory_space<smem>>
    %c0_0 = arith.constant 0 : index
    %c0_1 = arith.constant 0 : index
    %1 = vector.load %arg2[%c0_0, %c0_1] : memref<2056x128xf32, #tpu.memory_space<vmem>>, vector<2056x128xf32>
    %2 = vector.broadcast %0 : f32 to vector<2056x128xf32>
    %3 = arith.mulf %1, %2 : vector<2056x128xf32>
    %c0_2 = arith.constant 0 : index
    %c0_3 = arith.constant 0 : index
    %4 = vector.load %arg3[%c0_2, %c0_3] : memref<2056x128xf32, #tpu.memory_space<vmem>>, vector<2056x128xf32>
    tpu.vector_store %arg3[%c0_2, %c0_3], %3 {strides = array<i32>} : memref<2056x128xf32, #tpu.memory_space<vmem>>, vector<2056x128xf32>,
    return
  }
  func.func @transform_0(%arg0: i32) -> i32 {
    %c0_i32 = arith.constant 0 : i32
    %c0_i32_0 = arith.constant 0 : i32
    return %c0_i32 : i32
  }
  func.func @transform_1(%arg0: i32) -> (i32, i32) {
    %c0_i32 = arith.constant 0 : i32
    %c0_i32_0 = arith.constant 0 : i32
    return %arg0, %c0_i32 : i32, i32
  }
  func.func @transform_2(%arg0: i32) -> (i32, i32) {
    %c0_i32 = arith.constant 0 : i32
    %c0_i32_0 = arith.constant 0 : i32
    return %arg0, %c0_i32 : i32, i32
  }
}

</mosaic_0001>

<bundles_post_ra>
// kernel: tpu_custom_call.1
= control target key start
LH: loop header
LB: loop body
LE: loop exit
PB: predicated region body
PF: predicated region fallthrough
CT: control target
= control target key end

     0   :  { %s2176_s0 = inlined_call_operand.<no memory space> [shape: f32[1], index: 0, kind: input, shape index: {}]   ;;  %s2177_s1 = inlined_call_operand.hbm [shape: f32[4104,128], index: 1, kind: input, shape index: {}]   ;;  %s2178_s2 = inlined_call_operand.hbm [shape: f32[4104,128], index: 2, kind: output, shape index: {}]  }
   0x1   :  { %7 = sst [smem:[#allocation2]] %s2176_s0 }
   0x2   :  { %8 = vsyncpa [#allocation4], 0 }
   0x3   :  { %10 = vsyncpa [#allocation4 + $0x1], 0 }
   0x4   :  { %11 = vsyncpa [#allocation5], 0 }
   0x5   :  { %13 = vsyncpa [#allocation5 + $0x1], 0  ;;  %s1228_s11 = smov 0   ;;  %s1230_s12 = smov 0  }
   0x6   :  { %s1232_s13 = smov 0   ;;  %s1234_s14 = smov 0  }
   0x7 LB: > { %s1249_s0 = sadd.s32 4294967295, %s1202_s14   ;;  %s1045_s15 = sadd.s32 4294967294, %s1202_s14   ;;  %s1202_s14 = sphi %s1234_s14, %s2188_s14   ;;  %s1198_s13 = sphi %s1232_s13, %s2187_s13   ;;  %s1194_s12 = sphi %s1230_s12, %s2186_s12   ;;  %s1190_s11 = sphi %s1228_s11, %s2185_s11  }
   0x8   : > { %s1253_s16 = sadd.s32 1, %s1202_s14   ;;  %s47_s17 = sadd.s32 1, %s1198_s13 }
   0x9   : > { %s44_s18 = ssub.s32 %s1202_s14, %s1253_s16  ;;  %p54_p0 = scmp.ne.s32.totalorder %s1198_s13, %s1194_s12 }
   0xa   : > { %p45_p1 = scmp.eq.s32.totalorder %s44_s18, 0  ;;  %p55_p2 = scmp.eq.s32.totalorder %s1202_s14, 0 }
   0xb   : > { %p60_p3 = scmp.ne.s32.totalorder %s1194_s12, %s1190_s11  ;;  %p61_p4 = scmp.eq.s32.totalorder %s1249_s0, 0 }
   0xc   : > { %s1265_s19 = scalar_select %p45_p1, %s1198_s13, %s47_s17  }
   0xd   : > { %p56_p5 = por %p55_p2, %p54_p0  ;;  %p1267_p6 = por %p61_p4, %p60_p3 }
   0xe   : > { %p84_p7 = scmp.eq.s32.totalorder %s1249_s0, 1  ;;  %p90_p8 = scmp.eq.s32.totalorder %s1045_s15, 1 }
   0xf   : > { %p2179_p11 = scmp.ge.s32.totalorder %s1202_s14, 2 }
  0x10   : > { %p1272_p9 = por %p84_p7, %p54_p0  ;;  %p1276_p10 = por %p90_p8, %p60_p3 }
  0x11   : > { %109 = sbr.rel (%p2179_p11) target bundleno = 59 (0x3b), region = 20 }
  0x12   : > { %s2182_s22 = scalar_select %p1276_p10, 1, 0 }
  0x18   : > { %112 = sbr.rel (!%p56_p5) target bundleno = 59 (0x3b), region = 24  ;;  %s113_s23 = sand.u32 (%p56_p5), 1, %s1198_s13  }
  0x19   : > { %s118_s24 = smul.u32 (%p56_p5), 257, %s1202_s14  ;;  %s1288_s29 = scalar_lea.sflag (%p56_p5), [#allocation4], %s113_s23 }
  0x1a   : > { %s1063_s25 = smul.u32 (%p56_p5), 2056, %s113_s23 }
  0x1b   : > { %s119_s26 = ssub.s32 (%p56_p5), 513, %s118_s24 }
  0x1c   : > { %p120_p12 = scmp.lt.s32.totalorder (%p56_p5), %s119_s26, 257  ;;  %s117_s30 = scalar_lea.vmem (%p56_p5), [#allocation3], %s1063_s25 }
  0x1f   : > { %s2190_s26 = smov (!%p120_p12, %s119_s26), 257 }
  0x20   : > { %s1285_s27 = sshll.u32 %s2190_s26, 7 }
  0x21   : > { %s124_s28 = ssub.s32 32896, %s1285_s27 }
  0x22   : > { %125 = vsyncadd %s1288_s29, %s124_s28  ;;  %p1049_p13 = scmp.ne.s32.totalorder %s1285_s27, 0  ;;  %s1061_s3 = smul.u32 32896, %s1202_s14 }
  0x23   : > { %s130_s4 = sshll.u32 %s117_s30, 4  ;;  %s1112_s15 = scalar_lea.hbm %s2177_s1, 65664  ;;  %s1298_s4 = int_to_ptr.vmem [resolvable:$true] %s130_s4 }
  0x24   : > { %s1296_s7 = scalar_lea.hbm %s2177_s1, %s1061_s3 }
  0x25   : > { %s1108_s8 = scalar_lea.hbm %s1296_s7, %s1285_s27  ;;  %p1113_p3 = scmp.lt.u32.totalorder %s1296_s7, %s2177_s1 }
  0x26   : > { %p1109_p0 = scmp.ne.s32.totalorder %s1296_s7, %s1108_s8  ;;  %p1114_p4 = scmp.lt.u32.totalorder %s1112_s15, %s1108_s8 }
  0x27   : > { %p1116_p7 = scmp.lt.u32.totalorder %s1108_s8, %s1296_s7 }
  0x28   : > { %p1110_p1 = pnand %p1109_p0, %p1049_p13  ;;  %p1115_p5 = por %p1114_p4, %p1113_p3 }
  0x2a   : > { %p1111_p2 = pneg %p1110_p1  ;;  %p1117_p8 = por %p1116_p7, %p1115_p5 }
  0x2c   : > { %p1118_p12 = pnand %p1117_p8, %p1111_p2 }
  0x2e   : > { %1121 = shalt.err (!%p1118_p12)
}
  0x2f   : > { %s1122_s23 = scalar_lea.vmem %s1298_s4, %s1285_s27  ;;  %s1204_s24 = smov [#allocation3]  }
  0x30   : > { %p1123_p0 = scmp.ne.s32.totalorder %s1298_s4, %s1122_s23  ;;  %s1126_s25 = sshll.u32 %s1204_s24, 4  ;;  %s1127_s25 = int_to_ptr.vmem [resolvable:$false] %s1126_s25 }
  0x31   : > { %s1128_s26 = scalar_lea.vmem %s1127_s25, 65792  ;;  %p1129_p10 = scmp.lt.s32.totalorder %s1298_s4, %s1127_s25 }
  0x32   : > { %p1124_p1 = pnand %p1123_p0, %p1049_p13  ;;  %p1130_p3 = scmp.lt.s32.totalorder %s1128_s26, %s1122_s23 }
  0x34   : > { %p1125_p11 = pneg %p1124_p1  ;;  %p1131_p4 = por %p1130_p3, %p1129_p10 }
  0x36   : > { %p1132_p5 = pnand %p1131_p4, %p1125_p11 }
  0x38   : > { %1135 = shalt.err (!%p1132_p5)
}
  0x39   : > { %s1205_s28 = smov 128   ;;  %s1206_s30 = smov 8  }
  0x3a   : > { %136 = dma.hbm_to_vmem [thread:$0]  (%p1049_p13), %s1296_s7, %s1285_s27, %s1298_s4, %s1288_s29, %s1205_s28, %s1205_s28, %s1206_s30  }
  0x3b PF: > { %p1053_p2 = scmp.ge.s32.totalorder %s1202_s14, 1  ;;  %p138_p7 = scmp.lt.s32.totalorder %s1202_s14, 3 }
  0x3d   : > { %p139_p8 = pnand %p1053_p2, %p138_p7 }
  0x3e   : > { %s1328_s3 = sand.u32 (!%p139_p8), 1, %s1194_s12  }
  0x3f   : > { %142 = sbr.rel (%p139_p8) target bundleno = 237 (0xed), region = 28  ;;  %s145_s6 = scalar_lea.sflag (!%p139_p8), [#allocation4], %s1328_s3 }
  0x40   : > { %s1064_s5 = smul.u32 (!%p139_p8), 2056, %s1328_s3 }
  0x42   : > { %s1332_s8 = scalar_lea.vmem (!%p139_p8), [#allocation3], %s1064_s5 }
  0x46   : > { %1181 = dma.done.wait (%p1267_p6), %s145_s6, 32896  }
  0x47   : > { %1183 = vsyncadd (%p1267_p6), %s145_s6, 4294934400  ;;  %s179_s27 = sld [smem:[#allocation2]]  ;;  %v180_v0 = vld [vmem:[%s1332_s8] sm:$0xff]  ;;  %v181_v2 = vld [vmem:[%s1332_s8 + $0x8] sm:$0xff]  ;;  %s1355_s20 = scalar_lea.vmem [#allocation6], %s1064_s5 }
  0x48   : > { %v182_v3 = vld [vmem:[%s1332_s8 + $0x10] sm:$0xff]  ;;  %v183_v7 = vld [vmem:[%s1332_s8 + $0x18] sm:$0xff]  ;;  %v184_v8 = vld [vmem:[%s1332_s8 + $0x20] sm:$0xff]  ;;  %s953_s29 = scalar_lea.sflag [#allocation5], %s1328_s3  ;;  %s960_s4 = smul.u32 (%p1272_p9), 257, %s1249_s0 }
  0x49   : > { %v185_v9 = vld [vmem:[%s1332_s8 + $0x28] sm:$0xff]  ;;  %v186_v13 = vld [vmem:[%s1332_s8 + $0x30] sm:$0xff]  ;;  %v187_v14 = vld [vmem:[%s1332_s8 + $0x38] sm:$0xff] }
  0x4a   : > { %v188_v15 = vld [vmem:[%s1332_s8 + $0x40] sm:$0xff]  ;;  %v189_v19 = vld [vmem:[%s1332_s8 + $0x48] sm:$0xff]  ;;  %v190_v20 = vld [vmem:[%s1332_s8 + $0x50] sm:$0xff]  ;;  %s961_s7 = ssub.s32 (%p1272_p9), 513, %s960_s4 }
  0x4b   : > { %v191_v21 = vld [vmem:[%s1332_s8 + $0x58] sm:$0xff]  ;;  %v192_v25 = vld [vmem:[%s1332_s8 + $0x60] sm:$0xff]  ;;  %v193_v26 = vld [vmem:[%s1332_s8 + $0x68] sm:$0xff]  ;;  %p962_p6 = scmp.lt.s32.totalorder (%p1272_p9), %s961_s7, 257 }
  0x4c   : > { %v194_v27 = vld [vmem:[%s1332_s8 + $0x70] sm:$0xff]  ;;  %v195_v31 = vld [vmem:[%s1332_s8 + $0x78] sm:$0xff]  ;;  %v196_v32 = vld [vmem:[%s1332_s8 + $0x80] sm:$0xff] }
  0x4d   : > { %v1339_v1 = vstv %s179_s27  ;;  %v197_v33 = vld [vmem:[%s1332_s8 + $0x88] sm:$0xff]  ;;  %v198_v37 = vld [vmem:[%s1332_s8 + $0x90] sm:$0xff]  ;;  %v199_v38 = vld [vmem:[%s1332_s8 + $0x98] sm:$0xff] }
  0x4e   : > { %v438_v4 = vmul.f32 %v1339_v1, %v180_v0  ;;  %v439_v5 = vmul.f32 %v1339_v1, %v181_v2  ;;  %v440_v6 = vmul.f32 %v1339_v1, %v182_v3  ;;  %v441_v10 = vmul.f32 %v1339_v1, %v183_v7  ;;  %v200_v39 = vld [vmem:[%s1332_s8 + $0xa0] sm:$0xff]  ;;  %v201_v43 = vld [vmem:[%s1332_s8 + $0xa8] sm:$0xff]  ;;  %v202_v44 = vld [vmem:[%s1332_s8 + $0xb0] sm:$0xff] }
  0x4f   : > { %v442_v11 = vmul.f32 %v1339_v1, %v184_v8  ;;  %v443_v12 = vmul.f32 %v1339_v1, %v185_v9  ;;  %v444_v16 = vmul.f32 %v1339_v1, %v186_v13  ;;  %v445_v17 = vmul.f32 %v1339_v1, %v187_v14  ;;  %v203_v45 = vld [vmem:[%s1332_s8 + $0xb8] sm:$0xff]  ;;  %v204_v49 = vld [vmem:[%s1332_s8 + $0xc0] sm:$0xff]  ;;  %v205_v50 = vld [vmem:[%s1332_s8 + $0xc8] sm:$0xff] }
  0x50   : > { %695 = vst [vmem:[%s1355_s20] sm:$0xff] %v438_v4  ;;  %696 = vst [vmem:[%s1355_s20 + $0x8] sm:$0xff] %v439_v5  ;;  %v446_v18 = vmul.f32 %v1339_v1, %v188_v15  ;;  %v447_v22 = vmul.f32 %v1339_v1, %v189_v19  ;;  %v448_v23 = vmul.f32 %v1339_v1, %v190_v20  ;;  %v206_v51 = vld [vmem:[%s1332_s8 + $0xd0] sm:$0xff]  ;;  %v207_v55 = vld [vmem:[%s1332_s8 + $0xd8] sm:$0xff] }
  0x51   : > { %697 = vst [vmem:[%s1355_s20 + $0x10] sm:$0xff] %v440_v6  ;;  %698 = vst [vmem:[%s1355_s20 + $0x18] sm:$0xff] %v441_v10  ;;  %v449_v24 = vmul.f32 %v1339_v1, %v191_v21  ;;  %v450_v28 = vmul.f32 %v1339_v1, %v192_v25  ;;  %v451_v29 = vmul.f32 %v1339_v1, %v193_v26  ;;  %v208_v56 = vld [vmem:[%s1332_s8 + $0xe0] sm:$0xff]  ;;  %v209_v57 = vld [vmem:[%s1332_s8 + $0xe8] sm:$0xff] }
  0x52   : > { %699 = vst [vmem:[%s1355_s20 + $0x20] sm:$0xff] %v442_v11  ;;  %700 = vst [vmem:[%s1355_s20 + $0x28] sm:$0xff] %v443_v12  ;;  %v452_v30 = vmul.f32 %v1339_v1, %v194_v27  ;;  %v453_v34 = vmul.f32 %v1339_v1, %v195_v31  ;;  %v454_v35 = vmul.f32 %v1339_v1, %v196_v32  ;;  %v210_v61 = vld [vmem:[%s1332_s8 + $0xf0] sm:$0xff]  ;;  %v211_v62 = vld [vmem:[%s1332_s8 + $0xf8] sm:$0xff] }
  0x53   : > { %701 = vst [vmem:[%s1355_s20 + $0x30] sm:$0xff] %v444_v16  ;;  %702 = vst [vmem:[%s1355_s20 + $0x38] sm:$0xff] %v445_v17  ;;  %v455_v36 = vmul.f32 %v1339_v1, %v197_v33  ;;  %v456_v40 = vmul.f32 %v1339_v1, %v198_v37  ;;  %v457_v41 = vmul.f32 %v1339_v1, %v199_v38  ;;  %v212_v63 = vld [vmem:[%s1332_s8 + $0x100] sm:$0xff]  ;;  %v213_v4 = vld [vmem:[%s1332_s8 + $0x108] sm:$0xff] }
  0x54   : > { %703 = vst [vmem:[%s1355_s20 + $0x40] sm:$0xff] %v446_v18  ;;  %704 = vst [vmem:[%s1355_s20 + $0x48] sm:$0xff] %v447_v22  ;;  %v458_v42 = vmul.f32 %v1339_v1, %v200_v39  ;;  %v459_v46 = vmul.f32 %v1339_v1, %v201_v43  ;;  %v460_v47 = vmul.f32 %v1339_v1, %v202_v44  ;;  %v214_v5 = vld [vmem:[%s1332_s8 + $0x110] sm:$0xff]  ;;  %v215_v6 = vld [vmem:[%s1332_s8 + $0x118] sm:$0xff] }
  0x55   : > { %705 = vst [vmem:[%s1355_s20 + $0x50] sm:$0xff] %v448_v23  ;;  %706 = vst [vmem:[%s1355_s20 + $0x58] sm:$0xff] %v449_v24  ;;  %v461_v48 = vmul.f32 %v1339_v1, %v203_v45  ;;  %v462_v52 = vmul.f32 %v1339_v1, %v204_v49  ;;  %v463_v53 = vmul.f32 %v1339_v1, %v205_v50  ;;  %v216_v10 = vld [vmem:[%s1332_s8 + $0x120] sm:$0xff]  ;;  %v217_v11 = vld [vmem:[%s1332_s8 + $0x128] sm:$0xff] }
  0x56   : > { %707 = vst [vmem:[%s1355_s20 + $0x60] sm:$0xff] %v450_v28  ;;  %708 = vst [vmem:[%s1355_s20 + $0x68] sm:$0xff] %v451_v29  ;;  %v464_v54 = vmul.f32 %v1339_v1, %v206_v51  ;;  %v465_v58 = vmul.f32 %v1339_v1, %v207_v55  ;;  %v466_v59 = vmul.f32 %v1339_v1, %v208_v56  ;;  %v218_v12 = vld [vmem:[%s1332_s8 + $0x130] sm:$0xff]  ;;  %v219_v16 = vld [vmem:[%s1332_s8 + $0x138] sm:$0xff] }
  0x57   : > { %709 = vst [vmem:[%s1355_s20 + $0x70] sm:$0xff] %v452_v30  ;;  %710 = vst [vmem:[%s1355_s20 + $0x78] sm:$0xff] %v453_v34  ;;  %v467_v60 = vmul.f32 %v1339_v1, %v209_v57  ;;  %v468_v0 = vmul.f32 %v1339_v1, %v210_v61  ;;  %v469_v2 = vmul.f32 %v1339_v1, %v211_v62  ;;  %v220_v17 = vld [vmem:[%s1332_s8 + $0x140] sm:$0xff]  ;;  %v221_v18 = vld [vmem:[%s1332_s8 + $0x148] sm:$0xff] }
  0x58   : > { %711 = vst [vmem:[%s1355_s20 + $0x80] sm:$0xff] %v454_v35  ;;  %712 = vst [vmem:[%s1355_s20 + $0x88] sm:$0xff] %v455_v36  ;;  %v470_v3 = vmul.f32 %v1339_v1, %v212_v63  ;;  %v471_v7 = vmul.f32 %v1339_v1, %v213_v4  ;;  %v472_v8 = vmul.f32 %v1339_v1, %v214_v5  ;;  %v222_v22 = vld [vmem:[%s1332_s8 + $0x150] sm:$0xff]  ;;  %v223_v23 = vld [vmem:[%s1332_s8 + $0x158] sm:$0xff] }
  0x59   : > { %713 = vst [vmem:[%s1355_s20 + $0x90] sm:$0xff] %v456_v40  ;;  %714 = vst [vmem:[%s1355_s20 + $0x98] sm:$0xff] %v457_v41  ;;  %v473_v9 = vmul.f32 %v1339_v1, %v215_v6  ;;  %v474_v13 = vmul.f32 %v1339_v1, %v216_v10  ;;  %v475_v14 = vmul.f32 %v1339_v1, %v217_v11  ;;  %v224_v24 = vld [vmem:[%s1332_s8 + $0x160] sm:$0xff]  ;;  %v225_v28 = vld [vmem:[%s1332_s8 + $0x168] sm:$0xff] }
  0x5a   : > { %715 = vst [vmem:[%s1355_s20 + $0xa0] sm:$0xff] %v458_v42  ;;  %716 = vst [vmem:[%s1355_s20 + $0xa8] sm:$0xff] %v459_v46  ;;  %v476_v15 = vmul.f32 %v1339_v1, %v218_v12  ;;  %v477_v19 = vmul.f32 %v1339_v1, %v219_v16  ;;  %v478_v20 = vmul.f32 %v1339_v1, %v220_v17  ;;  %v226_v29 = vld [vmem:[%s1332_s8 + $0x170] sm:$0xff]  ;;  %v227_v30 = vld [vmem:[%s1332_s8 + $0x178] sm:$0xff] }
  0x5b   : > { %717 = vst [vmem:[%s1355_s20 + $0xb0] sm:$0xff] %v460_v47  ;;  %718 = vst [vmem:[%s1355_s20 + $0xb8] sm:$0xff] %v461_v48  ;;  %v479_v21 = vmul.f32 %v1339_v1, %v221_v18  ;;  %v480_v25 = vmul.f32 %v1339_v1, %v222_v22  ;;  %v481_v26 = vmul.f32 %v1339_v1, %v223_v23  ;;  %v228_v34 = vld [vmem:[%s1332_s8 + $0x180] sm:$0xff]  ;;  %v229_v35 = vld [vmem:[%s1332_s8 + $0x188] sm:$0xff] }
  0x5c   : > { %719 = vst [vmem:[%s1355_s20 + $0xc0] sm:$0xff] %v462_v52  ;;  %720 = vst [vmem:[%s1355_s20 + $0xc8] sm:$0xff] %v463_v53  ;;  %v482_v27 = vmul.f32 %v1339_v1, %v224_v24  ;;  %v483_v31 = vmul.f32 %v1339_v1, %v225_v28  ;;  %v484_v32 = vmul.f32 %v1339_v1, %v226_v29  ;;  %v230_v36 = vld [vmem:[%s1332_s8 + $0x190] sm:$0xff]  ;;  %v231_v40 = vld [vmem:[%s1332_s8 + $0x198] sm:$0xff] }
  0x5d   : > { %721 = vst [vmem:[%s1355_s20 + $0xd0] sm:$0xff] %v464_v54  ;;  %722 = vst [vmem:[%s1355_s20 + $0xd8] sm:$0xff] %v465_v58  ;;  %v485_v33 = vmul.f32 %v1339_v1, %v227_v30  ;;  %v486_v37 = vmul.f32 %v1339_v1, %v228_v34  ;;  %v487_v38 = vmul.f32 %v1339_v1, %v229_v35  ;;  %v232_v41 = vld [vmem:[%s1332_s8 + $0x1a0] sm:$0xff]  ;;  %v233_v42 = vld [vmem:[%s1332_s8 + $0x1a8] sm:$0xff] }
  0x5e   : > { %723 = vst [vmem:[%s1355_s20 + $0xe0] sm:$0xff] %v466_v59  ;;  %724 = vst [vmem:[%s1355_s20 + $0xe8] sm:$0xff] %v467_v60  ;;  %v488_v39 = vmul.f32 %v1339_v1, %v230_v36  ;;  %v489_v43 = vmul.f32 %v1339_v1, %v231_v40  ;;  %v490_v44 = vmul.f32 %v1339_v1, %v232_v41  ;;  %v234_v46 = vld [vmem:[%s1332_s8 + $0x1b0] sm:$0xff]  ;;  %v235_v47 = vld [vmem:[%s1332_s8 + $0x1b8] sm:$0xff] }
  0x5f   : > { %725 = vst [vmem:[%s1355_s20 + $0xf0] sm:$0xff] %v468_v0  ;;  %726 = vst [vmem:[%s1355_s20 + $0xf8] sm:$0xff] %v469_v2  ;;  %v491_v45 = vmul.f32 %v1339_v1, %v233_v42  ;;  %v236_v48 = vld [vmem:[%s1332_s8 + $0x1c0] sm:$0xff]  ;;  %v492_v49 = vmul.f32 %v1339_v1, %v234_v46  ;;  %v493_v50 = vmul.f32 %v1339_v1, %v235_v47  ;;  %v237_v52 = vld [vmem:[%s1332_s8 + $0x1c8] sm:$0xff] }
  0x60   : > { %727 = vst [vmem:[%s1355_s20 + $0x100] sm:$0xff] %v470_v3  ;;  %728 = vst [vmem:[%s1355_s20 + $0x108] sm:$0xff] %v471_v7  ;;  %v494_v51 = vmul.f32 %v1339_v1, %v236_v48  ;;  %v238_v53 = vld [vmem:[%s1332_s8 + $0x1d0] sm:$0xff]  ;;  %v239_v54 = vld [vmem:[%s1332_s8 + $0x1d8] sm:$0xff]  ;;  %v495_v55 = vmul.f32 %v1339_v1, %v237_v52 }
  0x61   : > { %729 = vst [vmem:[%s1355_s20 + $0x110] sm:$0xff] %v472_v8  ;;  %730 = vst [vmem:[%s1355_s20 + $0x118] sm:$0xff] %v473_v9  ;;  %v496_v56 = vmul.f32 %v1339_v1, %v238_v53  ;;  %v497_v57 = vmul.f32 %v1339_v1, %v239_v54  ;;  %v240_v58 = vld [vmem:[%s1332_s8 + $0x1e0] sm:$0xff]  ;;  %v241_v59 = vld [vmem:[%s1332_s8 + $0x1e8] sm:$0xff] }
  0x62   : > { %731 = vst [vmem:[%s1355_s20 + $0x120] sm:$0xff] %v474_v13  ;;  %732 = vst [vmem:[%s1355_s20 + $0x128] sm:$0xff] %v475_v14  ;;  %v242_v60 = vld [vmem:[%s1332_s8 + $0x1f0] sm:$0xff]  ;;  %v498_v61 = vmul.f32 %v1339_v1, %v240_v58  ;;  %v499_v62 = vmul.f32 %v1339_v1, %v241_v59  ;;  %v243_v0 = vld [vmem:[%s1332_s8 + $0x1f8] sm:$0xff] }
  0x63   : > { %733 = vst [vmem:[%s1355_s20 + $0x130] sm:$0xff] %v476_v15  ;;  %734 = vst [vmem:[%s1355_s20 + $0x138] sm:$0xff] %v477_v19  ;;  %v500_v63 = vmul.f32 %v1339_v1, %v242_v60  ;;  %v244_v2 = vld [vmem:[%s1332_s8 + $0x200] sm:$0xff]  ;;  %v245_v3 = vld [vmem:[%s1332_s8 + $0x208] sm:$0xff]  ;;  %v501_v4 = vmul.f32 %v1339_v1, %v243_v0 }
  0x64   : > { %735 = vst [vmem:[%s1355_s20 + $0x140] sm:$0xff] %v478_v20  ;;  %736 = vst [vmem:[%s1355_s20 + $0x148] sm:$0xff] %v479_v21  ;;  %v502_v5 = vmul.f32 %v1339_v1, %v244_v2  ;;  %v503_v6 = vmul.f32 %v1339_v1, %v245_v3  ;;  %v246_v7 = vld [vmem:[%s1332_s8 + $0x210] sm:$0xff]  ;;  %v247_v8 = vld [vmem:[%s1332_s8 + $0x218] sm:$0xff] }
  0x65   : > { %737 = vst [vmem:[%s1355_s20 + $0x150] sm:$0xff] %v480_v25  ;;  %738 = vst [vmem:[%s1355_s20 + $0x158] sm:$0xff] %v481_v26  ;;  %v248_v9 = vld [vmem:[%s1332_s8 + $0x220] sm:$0xff]  ;;  %v504_v10 = vmul.f32 %v1339_v1, %v246_v7  ;;  %v505_v11 = vmul.f32 %v1339_v1, %v247_v8  ;;  %v249_v13 = vld [vmem:[%s1332_s8 + $0x228] sm:$0xff] }
  0x66   : > { %739 = vst [vmem:[%s1355_s20 + $0x160] sm:$0xff] %v482_v27  ;;  %740 = vst [vmem:[%s1355_s20 + $0x168] sm:$0xff] %v483_v31  ;;  %v506_v12 = vmul.f32 %v1339_v1, %v248_v9  ;;  %v250_v14 = vld [vmem:[%s1332_s8 + $0x230] sm:$0xff]  ;;  %v251_v15 = vld [vmem:[%s1332_s8 + $0x238] sm:$0xff]  ;;  %v507_v16 = vmul.f32 %v1339_v1, %v249_v13 }
  0x67   : > { %741 = vst [vmem:[%s1355_s20 + $0x170] sm:$0xff] %v484_v32  ;;  %742 = vst [vmem:[%s1355_s20 + $0x178] sm:$0xff] %v485_v33  ;;  %v508_v17 = vmul.f32 %v1339_v1, %v250_v14  ;;  %v509_v18 = vmul.f32 %v1339_v1, %v251_v15  ;;  %v252_v19 = vld [vmem:[%s1332_s8 + $0x240] sm:$0xff]  ;;  %v253_v20 = vld [vmem:[%s1332_s8 + $0x248] sm:$0xff] }
  0x68   : > { %743 = vst [vmem:[%s1355_s20 + $0x180] sm:$0xff] %v486_v37  ;;  %744 = vst [vmem:[%s1355_s20 + $0x188] sm:$0xff] %v487_v38  ;;  %v254_v21 = vld [vmem:[%s1332_s8 + $0x250] sm:$0xff]  ;;  %v510_v22 = vmul.f32 %v1339_v1, %v252_v19  ;;  %v511_v23 = vmul.f32 %v1339_v1, %v253_v20  ;;  %v255_v25 = vld [vmem:[%s1332_s8 + $0x258] sm:$0xff] }
  0x69   : > { %745 = vst [vmem:[%s1355_s20 + $0x190] sm:$0xff] %v488_v39  ;;  %746 = vst [vmem:[%s1355_s20 + $0x198] sm:$0xff] %v489_v43  ;;  %v512_v24 = vmul.f32 %v1339_v1, %v254_v21  ;;  %v256_v26 = vld [vmem:[%s1332_s8 + $0x260] sm:$0xff]  ;;  %v257_v27 = vld [vmem:[%s1332_s8 + $0x268] sm:$0xff]  ;;  %v513_v28 = vmul.f32 %v1339_v1, %v255_v25 }
  0x6a   : > { %747 = vst [vmem:[%s1355_s20 + $0x1a0] sm:$0xff] %v490_v44  ;;  %748 = vst [vmem:[%s1355_s20 + $0x1a8] sm:$0xff] %v491_v45  ;;  %v514_v29 = vmul.f32 %v1339_v1, %v256_v26  ;;  %v515_v30 = vmul.f32 %v1339_v1, %v257_v27  ;;  %v258_v31 = vld [vmem:[%s1332_s8 + $0x270] sm:$0xff]  ;;  %v259_v32 = vld [vmem:[%s1332_s8 + $0x278] sm:$0xff] }
  0x6b   : > { %749 = vst [vmem:[%s1355_s20 + $0x1b0] sm:$0xff] %v492_v49  ;;  %750 = vst [vmem:[%s1355_s20 + $0x1b8] sm:$0xff] %v493_v50  ;;  %v260_v33 = vld [vmem:[%s1332_s8 + $0x280] sm:$0xff]  ;;  %v516_v34 = vmul.f32 %v1339_v1, %v258_v31  ;;  %v517_v35 = vmul.f32 %v1339_v1, %v259_v32  ;;  %v261_v37 = vld [vmem:[%s1332_s8 + $0x288] sm:$0xff] }
  0x6c   : > { %751 = vst [vmem:[%s1355_s20 + $0x1c0] sm:$0xff] %v494_v51  ;;  %752 = vst [vmem:[%s1355_s20 + $0x1c8] sm:$0xff] %v495_v55  ;;  %v518_v36 = vmul.f32 %v1339_v1, %v260_v33  ;;  %v262_v38 = vld [vmem:[%s1332_s8 + $0x290] sm:$0xff]  ;;  %v263_v39 = vld [vmem:[%s1332_s8 + $0x298] sm:$0xff]  ;;  %v519_v40 = vmul.f32 %v1339_v1, %v261_v37 }
  0x6d   : > { %753 = vst [vmem:[%s1355_s20 + $0x1d0] sm:$0xff] %v496_v56  ;;  %754 = vst [vmem:[%s1355_s20 + $0x1d8] sm:$0xff] %v497_v57  ;;  %v520_v41 = vmul.f32 %v1339_v1, %v262_v38  ;;  %v521_v42 = vmul.f32 %v1339_v1, %v263_v39  ;;  %v264_v43 = vld [vmem:[%s1332_s8 + $0x2a0] sm:$0xff]  ;;  %v265_v44 = vld [vmem:[%s1332_s8 + $0x2a8] sm:$0xff] }
  0x6e   : > { %755 = vst [vmem:[%s1355_s20 + $0x1e0] sm:$0xff] %v498_v61  ;;  %756 = vst [vmem:[%s1355_s20 + $0x1e8] sm:$0xff] %v499_v62  ;;  %v266_v45 = vld [vmem:[%s1332_s8 + $0x2b0] sm:$0xff]  ;;  %v522_v46 = vmul.f32 %v1339_v1, %v264_v43  ;;  %v523_v47 = vmul.f32 %v1339_v1, %v265_v44  ;;  %v267_v49 = vld [vmem:[%s1332_s8 + $0x2b8] sm:$0xff] }
  0x6f   : > { %757 = vst [vmem:[%s1355_s20 + $0x1f0] sm:$0xff] %v500_v63  ;;  %758 = vst [vmem:[%s1355_s20 + $0x1f8] sm:$0xff] %v501_v4  ;;  %v524_v48 = vmul.f32 %v1339_v1, %v266_v45  ;;  %v268_v50 = vld [vmem:[%s1332_s8 + $0x2c0] sm:$0xff]  ;;  %v269_v51 = vld [vmem:[%s1332_s8 + $0x2c8] sm:$0xff]  ;;  %v525_v52 = vmul.f32 %v1339_v1, %v267_v49 }
  0x70   : > { %759 = vst [vmem:[%s1355_s20 + $0x200] sm:$0xff] %v502_v5  ;;  %760 = vst [vmem:[%s1355_s20 + $0x208] sm:$0xff] %v503_v6  ;;  %v526_v53 = vmul.f32 %v1339_v1, %v268_v50  ;;  %v527_v54 = vmul.f32 %v1339_v1, %v269_v51  ;;  %v270_v55 = vld [vmem:[%s1332_s8 + $0x2d0] sm:$0xff]  ;;  %v271_v56 = vld [vmem:[%s1332_s8 + $0x2d8] sm:$0xff] }
  0x71   : > { %761 = vst [vmem:[%s1355_s20 + $0x210] sm:$0xff] %v504_v10  ;;  %762 = vst [vmem:[%s1355_s20 + $0x218] sm:$0xff] %v505_v11  ;;  %v272_v57 = vld [vmem:[%s1332_s8 + $0x2e0] sm:$0xff]  ;;  %v528_v58 = vmul.f32 %v1339_v1, %v270_v55  ;;  %v529_v59 = vmul.f32 %v1339_v1, %v271_v56  ;;  %v273_v61 = vld [vmem:[%s1332_s8 + $0x2e8] sm:$0xff] }
  0x72   : > { %763 = vst [vmem:[%s1355_s20 + $0x220] sm:$0xff] %v506_v12  ;;  %764 = vst [vmem:[%s1355_s20 + $0x228] sm:$0xff] %v507_v16  ;;  %v530_v60 = vmul.f32 %v1339_v1, %v272_v57  ;;  %v274_v62 = vld [vmem:[%s1332_s8 + $0x2f0] sm:$0xff]  ;;  %v275_v63 = vld [vmem:[%s1332_s8 + $0x2f8] sm:$0xff]  ;;  %v531_v0 = vmul.f32 %v1339_v1, %v273_v61 }
  0x73   : > { %765 = vst [vmem:[%s1355_s20 + $0x230] sm:$0xff] %v508_v17  ;;  %766 = vst [vmem:[%s1355_s20 + $0x238] sm:$0xff] %v509_v18  ;;  %v532_v2 = vmul.f32 %v1339_v1, %v274_v62  ;;  %v533_v3 = vmul.f32 %v1339_v1, %v275_v63  ;;  %v276_v4 = vld [vmem:[%s1332_s8 + $0x300] sm:$0xff]  ;;  %v277_v5 = vld [vmem:[%s1332_s8 + $0x308] sm:$0xff] }
  0x74   : > { %767 = vst [vmem:[%s1355_s20 + $0x240] sm:$0xff] %v510_v22  ;;  %768 = vst [vmem:[%s1355_s20 + $0x248] sm:$0xff] %v511_v23  ;;  %v278_v6 = vld [vmem:[%s1332_s8 + $0x310] sm:$0xff]  ;;  %v534_v7 = vmul.f32 %v1339_v1, %v276_v4  ;;  %v535_v8 = vmul.f32 %v1339_v1, %v277_v5  ;;  %v279_v10 = vld [vmem:[%s1332_s8 + $0x318] sm:$0xff] }
  0x75   : > { %769 = vst [vmem:[%s1355_s20 + $0x250] sm:$0xff] %v512_v24  ;;  %770 = vst [vmem:[%s1355_s20 + $0x258] sm:$0xff] %v513_v28  ;;  %v536_v9 = vmul.f32 %v1339_v1, %v278_v6  ;;  %v280_v11 = vld [vmem:[%s1332_s8 + $0x320] sm:$0xff]  ;;  %v281_v12 = vld [vmem:[%s1332_s8 + $0x328] sm:$0xff]  ;;  %v537_v13 = vmul.f32 %v1339_v1, %v279_v10 }
  0x76   : > { %771 = vst [vmem:[%s1355_s20 + $0x260] sm:$0xff] %v514_v29  ;;  %772 = vst [vmem:[%s1355_s20 + $0x268] sm:$0xff] %v515_v30  ;;  %v538_v14 = vmul.f32 %v1339_v1, %v280_v11  ;;  %v539_v15 = vmul.f32 %v1339_v1, %v281_v12  ;;  %v282_v16 = vld [vmem:[%s1332_s8 + $0x330] sm:$0xff]  ;;  %v283_v17 = vld [vmem:[%s1332_s8 + $0x338] sm:$0xff] }
  0x77   : > { %773 = vst [vmem:[%s1355_s20 + $0x270] sm:$0xff] %v516_v34  ;;  %774 = vst [vmem:[%s1355_s20 + $0x278] sm:$0xff] %v517_v35  ;;  %v284_v18 = vld [vmem:[%s1332_s8 + $0x340] sm:$0xff]  ;;  %v540_v19 = vmul.f32 %v1339_v1, %v282_v16  ;;  %v541_v20 = vmul.f32 %v1339_v1, %v283_v17  ;;  %v285_v22 = vld [vmem:[%s1332_s8 + $0x348] sm:$0xff] }
  0x78   : > { %775 = vst [vmem:[%s1355_s20 + $0x280] sm:$0xff] %v518_v36  ;;  %776 = vst [vmem:[%s1355_s20 + $0x288] sm:$0xff] %v519_v40  ;;  %v542_v21 = vmul.f32 %v1339_v1, %v284_v18  ;;  %v286_v23 = vld [vmem:[%s1332_s8 + $0x350] sm:$0xff]  ;;  %v287_v24 = vld [vmem:[%s1332_s8 + $0x358] sm:$0xff]  ;;  %v543_v25 = vmul.f32 %v1339_v1, %v285_v22 }
  0x79   : > { %777 = vst [vmem:[%s1355_s20 + $0x290] sm:$0xff] %v520_v41  ;;  %778 = vst [vmem:[%s1355_s20 + $0x298] sm:$0xff] %v521_v42  ;;  %v544_v26 = vmul.f32 %v1339_v1, %v286_v23  ;;  %v545_v27 = vmul.f32 %v1339_v1, %v287_v24  ;;  %v288_v28 = vld [vmem:[%s1332_s8 + $0x360] sm:$0xff]  ;;  %v289_v29 = vld [vmem:[%s1332_s8 + $0x368] sm:$0xff] }
  0x7a   : > { %779 = vst [vmem:[%s1355_s20 + $0x2a0] sm:$0xff] %v522_v46  ;;  %780 = vst [vmem:[%s1355_s20 + $0x2a8] sm:$0xff] %v523_v47  ;;  %v290_v30 = vld [vmem:[%s1332_s8 + $0x370] sm:$0xff]  ;;  %v546_v31 = vmul.f32 %v1339_v1, %v288_v28  ;;  %v547_v32 = vmul.f32 %v1339_v1, %v289_v29  ;;  %v291_v34 = vld [vmem:[%s1332_s8 + $0x378] sm:$0xff] }
  0x7b   : > { %781 = vst [vmem:[%s1355_s20 + $0x2b0] sm:$0xff] %v524_v48  ;;  %782 = vst [vmem:[%s1355_s20 + $0x2b8] sm:$0xff] %v525_v52  ;;  %v548_v33 = vmul.f32 %v1339_v1, %v290_v30  ;;  %v292_v35 = vld [vmem:[%s1332_s8 + $0x380] sm:$0xff]  ;;  %v293_v36 = vld [vmem:[%s1332_s8 + $0x388] sm:$0xff]  ;;  %v549_v37 = vmul.f32 %v1339_v1, %v291_v34 }
  0x7c   : > { %783 = vst [vmem:[%s1355_s20 + $0x2c0] sm:$0xff] %v526_v53  ;;  %784 = vst [vmem:[%s1355_s20 + $0x2c8] sm:$0xff] %v527_v54  ;;  %v550_v38 = vmul.f32 %v1339_v1, %v292_v35  ;;  %v551_v39 = vmul.f32 %v1339_v1, %v293_v36  ;;  %v294_v40 = vld [vmem:[%s1332_s8 + $0x390] sm:$0xff]  ;;  %v295_v41 = vld [vmem:[%s1332_s8 + $0x398] sm:$0xff] }
  0x7d   : > { %785 = vst [vmem:[%s1355_s20 + $0x2d0] sm:$0xff] %v528_v58  ;;  %786 = vst [vmem:[%s1355_s20 + $0x2d8] sm:$0xff] %v529_v59  ;;  %v296_v42 = vld [vmem:[%s1332_s8 + $0x3a0] sm:$0xff]  ;;  %v552_v43 = vmul.f32 %v1339_v1, %v294_v40  ;;  %v553_v44 = vmul.f32 %v1339_v1, %v295_v41  ;;  %v297_v46 = vld [vmem:[%s1332_s8 + $0x3a8] sm:$0xff] }
  0x7e   : > { %787 = vst [vmem:[%s1355_s20 + $0x2e0] sm:$0xff] %v530_v60  ;;  %788 = vst [vmem:[%s1355_s20 + $0x2e8] sm:$0xff] %v531_v0  ;;  %v554_v45 = vmul.f32 %v1339_v1, %v296_v42  ;;  %v298_v47 = vld [vmem:[%s1332_s8 + $0x3b0] sm:$0xff]  ;;  %v299_v48 = vld [vmem:[%s1332_s8 + $0x3b8] sm:$0xff]  ;;  %v555_v49 = vmul.f32 %v1339_v1, %v297_v46 }
  0x7f   : > { %789 = vst [vmem:[%s1355_s20 + $0x2f0] sm:$0xff] %v532_v2  ;;  %790 = vst [vmem:[%s1355_s20 + $0x2f8] sm:$0xff] %v533_v3  ;;  %v556_v50 = vmul.f32 %v1339_v1, %v298_v47  ;;  %v557_v51 = vmul.f32 %v1339_v1, %v299_v48  ;;  %v300_v52 = vld [vmem:[%s1332_s8 + $0x3c0] sm:$0xff]  ;;  %v301_v53 = vld [vmem:[%s1332_s8 + $0x3c8] sm:$0xff] }
  0x80   : > { %791 = vst [vmem:[%s1355_s20 + $0x300] sm:$0xff] %v534_v7  ;;  %792 = vst [vmem:[%s1355_s20 + $0x308] sm:$0xff] %v535_v8  ;;  %v302_v54 = vld [vmem:[%s1332_s8 + $0x3d0] sm:$0xff]  ;;  %v558_v55 = vmul.f32 %v1339_v1, %v300_v52  ;;  %v559_v56 = vmul.f32 %v1339_v1, %v301_v53  ;;  %v303_v58 = vld [vmem:[%s1332_s8 + $0x3d8] sm:$0xff] }
  0x81   : > { %793 = vst [vmem:[%s1355_s20 + $0x310] sm:$0xff] %v536_v9  ;;  %794 = vst [vmem:[%s1355_s20 + $0x318] sm:$0xff] %v537_v13  ;;  %v560_v57 = vmul.f32 %v1339_v1, %v302_v54  ;;  %v304_v59 = vld [vmem:[%s1332_s8 + $0x3e0] sm:$0xff]  ;;  %v305_v60 = vld [vmem:[%s1332_s8 + $0x3e8] sm:$0xff]  ;;  %v561_v61 = vmul.f32 %v1339_v1, %v303_v58 }
  0x82   : > { %795 = vst [vmem:[%s1355_s20 + $0x320] sm:$0xff] %v538_v14  ;;  %796 = vst [vmem:[%s1355_s20 + $0x328] sm:$0xff] %v539_v15  ;;  %v562_v62 = vmul.f32 %v1339_v1, %v304_v59  ;;  %v563_v63 = vmul.f32 %v1339_v1, %v305_v60  ;;  %v306_v0 = vld [vmem:[%s1332_s8 + $0x3f0] sm:$0xff]  ;;  %v307_v2 = vld [vmem:[%s1332_s8 + $0x3f8] sm:$0xff] }
  0x83   : > { %797 = vst [vmem:[%s1355_s20 + $0x330] sm:$0xff] %v540_v19  ;;  %798 = vst [vmem:[%s1355_s20 + $0x338] sm:$0xff] %v541_v20  ;;  %v308_v3 = vld [vmem:[%s1332_s8 + $0x400] sm:$0xff]  ;;  %v564_v4 = vmul.f32 %v1339_v1, %v306_v0  ;;  %v565_v5 = vmul.f32 %v1339_v1, %v307_v2  ;;  %v309_v7 = vld [vmem:[%s1332_s8 + $0x408] sm:$0xff] }
  0x84   : > { %799 = vst [vmem:[%s1355_s20 + $0x340] sm:$0xff] %v542_v21  ;;  %800 = vst [vmem:[%s1355_s20 + $0x348] sm:$0xff] %v543_v25  ;;  %v566_v6 = vmul.f32 %v1339_v1, %v308_v3  ;;  %v310_v8 = vld [vmem:[%s1332_s8 + $0x410] sm:$0xff]  ;;  %v311_v9 = vld [vmem:[%s1332_s8 + $0x418] sm:$0xff]  ;;  %v567_v10 = vmul.f32 %v1339_v1, %v309_v7 }
  0x85   : > { %801 = vst [vmem:[%s1355_s20 + $0x350] sm:$0xff] %v544_v26  ;;  %802 = vst [vmem:[%s1355_s20 + $0x358] sm:$0xff] %v545_v27  ;;  %v568_v11 = vmul.f32 %v1339_v1, %v310_v8  ;;  %v569_v12 = vmul.f32 %v1339_v1, %v311_v9  ;;  %v312_v13 = vld [vmem:[%s1332_s8 + $0x420] sm:$0xff]  ;;  %v313_v14 = vld [vmem:[%s1332_s8 + $0x428] sm:$0xff] }
  0x86   : > { %803 = vst [vmem:[%s1355_s20 + $0x360] sm:$0xff] %v546_v31  ;;  %804 = vst [vmem:[%s1355_s20 + $0x368] sm:$0xff] %v547_v32  ;;  %v314_v15 = vld [vmem:[%s1332_s8 + $0x430] sm:$0xff]  ;;  %v570_v16 = vmul.f32 %v1339_v1, %v312_v13  ;;  %v571_v17 = vmul.f32 %v1339_v1, %v313_v14  ;;  %v315_v19 = vld [vmem:[%s1332_s8 + $0x438] sm:$0xff] }
  0x87   : > { %805 = vst [vmem:[%s1355_s20 + $0x370] sm:$0xff] %v548_v33  ;;  %806 = vst [vmem:[%s1355_s20 + $0x378] sm:$0xff] %v549_v37  ;;  %v572_v18 = vmul.f32 %v1339_v1, %v314_v15  ;;  %v316_v20 = vld [vmem:[%s1332_s8 + $0x440] sm:$0xff]  ;;  %v317_v21 = vld [vmem:[%s1332_s8 + $0x448] sm:$0xff]  ;;  %v573_v22 = vmul.f32 %v1339_v1, %v315_v19 }
  0x88   : > { %807 = vst [vmem:[%s1355_s20 + $0x380] sm:$0xff] %v550_v38  ;;  %808 = vst [vmem:[%s1355_s20 + $0x388] sm:$0xff] %v551_v39  ;;  %v574_v23 = vmul.f32 %v1339_v1, %v316_v20  ;;  %v575_v24 = vmul.f32 %v1339_v1, %v317_v21  ;;  %v318_v25 = vld [vmem:[%s1332_s8 + $0x450] sm:$0xff]  ;;  %v319_v26 = vld [vmem:[%s1332_s8 + $0x458] sm:$0xff] }
  0x89   : > { %809 = vst [vmem:[%s1355_s20 + $0x390] sm:$0xff] %v552_v43  ;;  %810 = vst [vmem:[%s1355_s20 + $0x398] sm:$0xff] %v553_v44  ;;  %v320_v27 = vld [vmem:[%s1332_s8 + $0x460] sm:$0xff]  ;;  %v576_v28 = vmul.f32 %v1339_v1, %v318_v25  ;;  %v577_v29 = vmul.f32 %v1339_v1, %v319_v26  ;;  %v321_v31 = vld [vmem:[%s1332_s8 + $0x468] sm:$0xff] }
  0x8a   : > { %811 = vst [vmem:[%s1355_s20 + $0x3a0] sm:$0xff] %v554_v45  ;;  %812 = vst [vmem:[%s1355_s20 + $0x3a8] sm:$0xff] %v555_v49  ;;  %v578_v30 = vmul.f32 %v1339_v1, %v320_v27  ;;  %v322_v32 = vld [vmem:[%s1332_s8 + $0x470] sm:$0xff]  ;;  %v323_v33 = vld [vmem:[%s1332_s8 + $0x478] sm:$0xff]  ;;  %v579_v34 = vmul.f32 %v1339_v1, %v321_v31 }
  0x8b   : > { %813 = vst [vmem:[%s1355_s20 + $0x3b0] sm:$0xff] %v556_v50  ;;  %814 = vst [vmem:[%s1355_s20 + $0x3b8] sm:$0xff] %v557_v51  ;;  %v580_v35 = vmul.f32 %v1339_v1, %v322_v32  ;;  %v581_v36 = vmul.f32 %v1339_v1, %v323_v33  ;;  %v324_v37 = vld [vmem:[%s1332_s8 + $0x480] sm:$0xff]  ;;  %v325_v38 = vld [vmem:[%s1332_s8 + $0x488] sm:$0xff] }
  0x8c   : > { %815 = vst [vmem:[%s1355_s20 + $0x3c0] sm:$0xff] %v558_v55  ;;  %816 = vst [vmem:[%s1355_s20 + $0x3c8] sm:$0xff] %v559_v56  ;;  %v326_v39 = vld [vmem:[%s1332_s8 + $0x490] sm:$0xff]  ;;  %v582_v40 = vmul.f32 %v1339_v1, %v324_v37  ;;  %v583_v41 = vmul.f32 %v1339_v1, %v325_v38  ;;  %v327_v43 = vld [vmem:[%s1332_s8 + $0x498] sm:$0xff] }
  0x8d   : > { %817 = vst [vmem:[%s1355_s20 + $0x3d0] sm:$0xff] %v560_v57  ;;  %818 = vst [vmem:[%s1355_s20 + $0x3d8] sm:$0xff] %v561_v61  ;;  %v584_v42 = vmul.f32 %v1339_v1, %v326_v39  ;;  %v328_v44 = vld [vmem:[%s1332_s8 + $0x4a0] sm:$0xff]  ;;  %v329_v45 = vld [vmem:[%s1332_s8 + $0x4a8] sm:$0xff]  ;;  %v585_v46 = vmul.f32 %v1339_v1, %v327_v43 }
  0x8e   : > { %819 = vst [vmem:[%s1355_s20 + $0x3e0] sm:$0xff] %v562_v62  ;;  %820 = vst [vmem:[%s1355_s20 + $0x3e8] sm:$0xff] %v563_v63  ;;  %v586_v47 = vmul.f32 %v1339_v1, %v328_v44  ;;  %v587_v48 = vmul.f32 %v1339_v1, %v329_v45  ;;  %v330_v49 = vld [vmem:[%s1332_s8 + $0x4b0] sm:$0xff]  ;;  %v331_v50 = vld [vmem:[%s1332_s8 + $0x4b8] sm:$0xff] }
  0x8f   : > { %821 = vst [vmem:[%s1355_s20 + $0x3f0] sm:$0xff] %v564_v4  ;;  %822 = vst [vmem:[%s1355_s20 + $0x3f8] sm:$0xff] %v565_v5  ;;  %v332_v51 = vld [vmem:[%s1332_s8 + $0x4c0] sm:$0xff]  ;;  %v588_v52 = vmul.f32 %v1339_v1, %v330_v49  ;;  %v589_v53 = vmul.f32 %v1339_v1, %v331_v50  ;;  %v333_v55 = vld [vmem:[%s1332_s8 + $0x4c8] sm:$0xff] }
  0x90   : > { %823 = vst [vmem:[%s1355_s20 + $0x400] sm:$0xff] %v566_v6  ;;  %824 = vst [vmem:[%s1355_s20 + $0x408] sm:$0xff] %v567_v10  ;;  %v590_v54 = vmul.f32 %v1339_v1, %v332_v51  ;;  %v334_v56 = vld [vmem:[%s1332_s8 + $0x4d0] sm:$0xff]  ;;  %v335_v57 = vld [vmem:[%s1332_s8 + $0x4d8] sm:$0xff]  ;;  %v591_v58 = vmul.f32 %v1339_v1, %v333_v55 }
  0x91   : > { %825 = vst [vmem:[%s1355_s20 + $0x410] sm:$0xff] %v568_v11  ;;  %826 = vst [vmem:[%s1355_s20 + $0x418] sm:$0xff] %v569_v12  ;;  %v592_v59 = vmul.f32 %v1339_v1, %v334_v56  ;;  %v593_v60 = vmul.f32 %v1339_v1, %v335_v57  ;;  %v336_v61 = vld [vmem:[%s1332_s8 + $0x4e0] sm:$0xff]  ;;  %v337_v62 = vld [vmem:[%s1332_s8 + $0x4e8] sm:$0xff] }
  0x92   : > { %827 = vst [vmem:[%s1355_s20 + $0x420] sm:$0xff] %v570_v16  ;;  %828 = vst [vmem:[%s1355_s20 + $0x428] sm:$0xff] %v571_v17  ;;  %v338_v63 = vld [vmem:[%s1332_s8 + $0x4f0] sm:$0xff]  ;;  %v594_v0 = vmul.f32 %v1339_v1, %v336_v61  ;;  %v595_v2 = vmul.f32 %v1339_v1, %v337_v62  ;;  %v339_v4 = vld [vmem:[%s1332_s8 + $0x4f8] sm:$0xff] }
  0x93   : > { %829 = vst [vmem:[%s1355_s20 + $0x430] sm:$0xff] %v572_v18  ;;  %830 = vst [vmem:[%s1355_s20 + $0x438] sm:$0xff] %v573_v22  ;;  %v596_v3 = vmul.f32 %v1339_v1, %v338_v63  ;;  %v340_v5 = vld [vmem:[%s1332_s8 + $0x500] sm:$0xff]  ;;  %v341_v6 = vld [vmem:[%s1332_s8 + $0x508] sm:$0xff]  ;;  %v597_v7 = vmul.f32 %v1339_v1, %v339_v4 }
  0x94   : > { %831 = vst [vmem:[%s1355_s20 + $0x440] sm:$0xff] %v574_v23  ;;  %832 = vst [vmem:[%s1355_s20 + $0x448] sm:$0xff] %v575_v24  ;;  %v598_v8 = vmul.f32 %v1339_v1, %v340_v5  ;;  %v599_v9 = vmul.f32 %v1339_v1, %v341_v6  ;;  %v342_v10 = vld [vmem:[%s1332_s8 + $0x510] sm:$0xff]  ;;  %v343_v11 = vld [vmem:[%s1332_s8 + $0x518] sm:$0xff] }
  0x95   : > { %833 = vst [vmem:[%s1355_s20 + $0x450] sm:$0xff] %v576_v28  ;;  %834 = vst [vmem:[%s1355_s20 + $0x458] sm:$0xff] %v577_v29  ;;  %v344_v12 = vld [vmem:[%s1332_s8 + $0x520] sm:$0xff]  ;;  %v600_v13 = vmul.f32 %v1339_v1, %v342_v10  ;;  %v601_v14 = vmul.f32 %v1339_v1, %v343_v11  ;;  %v345_v16 = vld [vmem:[%s1332_s8 + $0x528] sm:$0xff] }
  0x96   : > { %835 = vst [vmem:[%s1355_s20 + $0x460] sm:$0xff] %v578_v30  ;;  %836 = vst [vmem:[%s1355_s20 + $0x468] sm:$0xff] %v579_v34  ;;  %v602_v15 = vmul.f32 %v1339_v1, %v344_v12  ;;  %v346_v17 = vld [vmem:[%s1332_s8 + $0x530] sm:$0xff]  ;;  %v347_v18 = vld [vmem:[%s1332_s8 + $0x538] sm:$0xff]  ;;  %v603_v19 = vmul.f32 %v1339_v1, %v345_v16 }
  0x97   : > { %837 = vst [vmem:[%s1355_s20 + $0x470] sm:$0xff] %v580_v35  ;;  %838 = vst [vmem:[%s1355_s20 + $0x478] sm:$0xff] %v581_v36  ;;  %v604_v20 = vmul.f32 %v1339_v1, %v346_v17  ;;  %v605_v21 = vmul.f32 %v1339_v1, %v347_v18  ;;  %v348_v22 = vld [vmem:[%s1332_s8 + $0x540] sm:$0xff]  ;;  %v349_v23 = vld [vmem:[%s1332_s8 + $0x548] sm:$0xff] }
  0x98   : > { %839 = vst [vmem:[%s1355_s20 + $0x480] sm:$0xff] %v582_v40  ;;  %840 = vst [vmem:[%s1355_s20 + $0x488] sm:$0xff] %v583_v41  ;;  %v350_v24 = vld [vmem:[%s1332_s8 + $0x550] sm:$0xff]  ;;  %v606_v25 = vmul.f32 %v1339_v1, %v348_v22  ;;  %v607_v26 = vmul.f32 %v1339_v1, %v349_v23  ;;  %v351_v28 = vld [vmem:[%s1332_s8 + $0x558] sm:$0xff] }
  0x99   : > { %841 = vst [vmem:[%s1355_s20 + $0x490] sm:$0xff] %v584_v42  ;;  %842 = vst [vmem:[%s1355_s20 + $0x498] sm:$0xff] %v585_v46  ;;  %v608_v27 = vmul.f32 %v1339_v1, %v350_v24  ;;  %v352_v29 = vld [vmem:[%s1332_s8 + $0x560] sm:$0xff]  ;;  %v353_v30 = vld [vmem:[%s1332_s8 + $0x568] sm:$0xff]  ;;  %v609_v31 = vmul.f32 %v1339_v1, %v351_v28 }
  0x9a   : > { %843 = vst [vmem:[%s1355_s20 + $0x4a0] sm:$0xff] %v586_v47  ;;  %844 = vst [vmem:[%s1355_s20 + $0x4a8] sm:$0xff] %v587_v48  ;;  %v610_v32 = vmul.f32 %v1339_v1, %v352_v29  ;;  %v611_v33 = vmul.f32 %v1339_v1, %v353_v30  ;;  %v354_v34 = vld [vmem:[%s1332_s8 + $0x570] sm:$0xff]  ;;  %v355_v35 = vld [vmem:[%s1332_s8 + $0x578] sm:$0xff] }
  0x9b   : > { %845 = vst [vmem:[%s1355_s20 + $0x4b0] sm:$0xff] %v588_v52  ;;  %846 = vst [vmem:[%s1355_s20 + $0x4b8] sm:$0xff] %v589_v53  ;;  %v356_v36 = vld [vmem:[%s1332_s8 + $0x580] sm:$0xff]  ;;  %v612_v37 = vmul.f32 %v1339_v1, %v354_v34  ;;  %v613_v38 = vmul.f32 %v1339_v1, %v355_v35  ;;  %v357_v40 = vld [vmem:[%s1332_s8 + $0x588] sm:$0xff] }
  0x9c   : > { %847 = vst [vmem:[%s1355_s20 + $0x4c0] sm:$0xff] %v590_v54  ;;  %848 = vst [vmem:[%s1355_s20 + $0x4c8] sm:$0xff] %v591_v58  ;;  %v614_v39 = vmul.f32 %v1339_v1, %v356_v36  ;;  %v358_v41 = vld [vmem:[%s1332_s8 + $0x590] sm:$0xff]  ;;  %v359_v42 = vld [vmem:[%s1332_s8 + $0x598] sm:$0xff]  ;;  %v615_v43 = vmul.f32 %v1339_v1, %v357_v40 }
  0x9d   : > { %849 = vst [vmem:[%s1355_s20 + $0x4d0] sm:$0xff] %v592_v59  ;;  %850 = vst [vmem:[%s1355_s20 + $0x4d8] sm:$0xff] %v593_v60  ;;  %v616_v44 = vmul.f32 %v1339_v1, %v358_v41  ;;  %v617_v45 = vmul.f32 %v1339_v1, %v359_v42  ;;  %v360_v46 = vld [vmem:[%s1332_s8 + $0x5a0] sm:$0xff]  ;;  %v361_v47 = vld [vmem:[%s1332_s8 + $0x5a8] sm:$0xff] }
  0x9e   : > { %851 = vst [vmem:[%s1355_s20 + $0x4e0] sm:$0xff] %v594_v0  ;;  %852 = vst [vmem:[%s1355_s20 + $0x4e8] sm:$0xff] %v595_v2  ;;  %v362_v48 = vld [vmem:[%s1332_s8 + $0x5b0] sm:$0xff]  ;;  %v618_v49 = vmul.f32 %v1339_v1, %v360_v46  ;;  %v619_v50 = vmul.f32 %v1339_v1, %v361_v47  ;;  %v363_v52 = vld [vmem:[%s1332_s8 + $0x5b8] sm:$0xff] }
  0x9f   : > { %853 = vst [vmem:[%s1355_s20 + $0x4f0] sm:$0xff] %v596_v3  ;;  %854 = vst [vmem:[%s1355_s20 + $0x4f8] sm:$0xff] %v597_v7  ;;  %v620_v51 = vmul.f32 %v1339_v1, %v362_v48  ;;  %v364_v53 = vld [vmem:[%s1332_s8 + $0x5c0] sm:$0xff]  ;;  %v365_v54 = vld [vmem:[%s1332_s8 + $0x5c8] sm:$0xff]  ;;  %v621_v55 = vmul.f32 %v1339_v1, %v363_v52 }
  0xa0   : > { %855 = vst [vmem:[%s1355_s20 + $0x500] sm:$0xff] %v598_v8  ;;  %856 = vst [vmem:[%s1355_s20 + $0x508] sm:$0xff] %v599_v9  ;;  %v622_v56 = vmul.f32 %v1339_v1, %v364_v53  ;;  %v623_v57 = vmul.f32 %v1339_v1, %v365_v54  ;;  %v366_v58 = vld [vmem:[%s1332_s8 + $0x5d0] sm:$0xff]  ;;  %v367_v59 = vld [vmem:[%s1332_s8 + $0x5d8] sm:$0xff] }
  0xa1   : > { %857 = vst [vmem:[%s1355_s20 + $0x510] sm:$0xff] %v600_v13  ;;  %858 = vst [vmem:[%s1355_s20 + $0x518] sm:$0xff] %v601_v14  ;;  %v368_v60 = vld [vmem:[%s1332_s8 + $0x5e0] sm:$0xff]  ;;  %v624_v61 = vmul.f32 %v1339_v1, %v366_v58  ;;  %v625_v62 = vmul.f32 %v1339_v1, %v367_v59  ;;  %v369_v0 = vld [vmem:[%s1332_s8 + $0x5e8] sm:$0xff] }
  0xa2   : > { %859 = vst [vmem:[%s1355_s20 + $0x520] sm:$0xff] %v602_v15  ;;  %860 = vst [vmem:[%s1355_s20 + $0x528] sm:$0xff] %v603_v19  ;;  %v626_v63 = vmul.f32 %v1339_v1, %v368_v60  ;;  %v370_v2 = vld [vmem:[%s1332_s8 + $0x5f0] sm:$0xff]  ;;  %v371_v3 = vld [vmem:[%s1332_s8 + $0x5f8] sm:$0xff]  ;;  %v627_v4 = vmul.f32 %v1339_v1, %v369_v0 }
  0xa3   : > { %861 = vst [vmem:[%s1355_s20 + $0x530] sm:$0xff] %v604_v20  ;;  %862 = vst [vmem:[%s1355_s20 + $0x538] sm:$0xff] %v605_v21  ;;  %v628_v5 = vmul.f32 %v1339_v1, %v370_v2  ;;  %v629_v6 = vmul.f32 %v1339_v1, %v371_v3  ;;  %v372_v7 = vld [vmem:[%s1332_s8 + $0x600] sm:$0xff]  ;;  %v373_v8 = vld [vmem:[%s1332_s8 + $0x608] sm:$0xff] }
  0xa4   : > { %863 = vst [vmem:[%s1355_s20 + $0x540] sm:$0xff] %v606_v25  ;;  %864 = vst [vmem:[%s1355_s20 + $0x548] sm:$0xff] %v607_v26  ;;  %v374_v9 = vld [vmem:[%s1332_s8 + $0x610] sm:$0xff]  ;;  %v630_v10 = vmul.f32 %v1339_v1, %v372_v7  ;;  %v631_v11 = vmul.f32 %v1339_v1, %v373_v8  ;;  %v375_v13 = vld [vmem:[%s1332_s8 + $0x618] sm:$0xff] }
  0xa5   : > { %865 = vst [vmem:[%s1355_s20 + $0x550] sm:$0xff] %v608_v27  ;;  %866 = vst [vmem:[%s1355_s20 + $0x558] sm:$0xff] %v609_v31  ;;  %v632_v12 = vmul.f32 %v1339_v1, %v374_v9  ;;  %v376_v14 = vld [vmem:[%s1332_s8 + $0x620] sm:$0xff]  ;;  %v377_v15 = vld [vmem:[%s1332_s8 + $0x628] sm:$0xff]  ;;  %v633_v16 = vmul.f32 %v1339_v1, %v375_v13 }
  0xa6   : > { %867 = vst [vmem:[%s1355_s20 + $0x560] sm:$0xff] %v610_v32  ;;  %868 = vst [vmem:[%s1355_s20 + $0x568] sm:$0xff] %v611_v33  ;;  %v634_v17 = vmul.f32 %v1339_v1, %v376_v14  ;;  %v635_v18 = vmul.f32 %v1339_v1, %v377_v15  ;;  %v378_v19 = vld [vmem:[%s1332_s8 + $0x630] sm:$0xff]  ;;  %v379_v20 = vld [vmem:[%s1332_s8 + $0x638] sm:$0xff] }
  0xa7   : > { %869 = vst [vmem:[%s1355_s20 + $0x570] sm:$0xff] %v612_v37  ;;  %870 = vst [vmem:[%s1355_s20 + $0x578] sm:$0xff] %v613_v38  ;;  %v380_v21 = vld [vmem:[%s1332_s8 + $0x640] sm:$0xff]  ;;  %v636_v22 = vmul.f32 %v1339_v1, %v378_v19  ;;  %v637_v23 = vmul.f32 %v1339_v1, %v379_v20  ;;  %v381_v25 = vld [vmem:[%s1332_s8 + $0x648] sm:$0xff] }
  0xa8   : > { %871 = vst [vmem:[%s1355_s20 + $0x580] sm:$0xff] %v614_v39  ;;  %872 = vst [vmem:[%s1355_s20 + $0x588] sm:$0xff] %v615_v43  ;;  %v638_v24 = vmul.f32 %v1339_v1, %v380_v21  ;;  %v382_v26 = vld [vmem:[%s1332_s8 + $0x650] sm:$0xff]  ;;  %v383_v27 = vld [vmem:[%s1332_s8 + $0x658] sm:$0xff]  ;;  %v639_v28 = vmul.f32 %v1339_v1, %v381_v25 }
  0xa9   : > { %873 = vst [vmem:[%s1355_s20 + $0x590] sm:$0xff] %v616_v44  ;;  %874 = vst [vmem:[%s1355_s20 + $0x598] sm:$0xff] %v617_v45  ;;  %v640_v29 = vmul.f32 %v1339_v1, %v382_v26  ;;  %v641_v30 = vmul.f32 %v1339_v1, %v383_v27  ;;  %v384_v31 = vld [vmem:[%s1332_s8 + $0x660] sm:$0xff]  ;;  %v385_v32 = vld [vmem:[%s1332_s8 + $0x668] sm:$0xff] }
  0xaa   : > { %875 = vst [vmem:[%s1355_s20 + $0x5a0] sm:$0xff] %v618_v49  ;;  %876 = vst [vmem:[%s1355_s20 + $0x5a8] sm:$0xff] %v619_v50  ;;  %v386_v33 = vld [vmem:[%s1332_s8 + $0x670] sm:$0xff]  ;;  %v642_v34 = vmul.f32 %v1339_v1, %v384_v31  ;;  %v643_v35 = vmul.f32 %v1339_v1, %v385_v32  ;;  %v387_v37 = vld [vmem:[%s1332_s8 + $0x678] sm:$0xff] }
  0xab   : > { %877 = vst [vmem:[%s1355_s20 + $0x5b0] sm:$0xff] %v620_v51  ;;  %878 = vst [vmem:[%s1355_s20 + $0x5b8] sm:$0xff] %v621_v55  ;;  %v644_v36 = vmul.f32 %v1339_v1, %v386_v33  ;;  %v388_v38 = vld [vmem:[%s1332_s8 + $0x680] sm:$0xff]  ;;  %v389_v39 = vld [vmem:[%s1332_s8 + $0x688] sm:$0xff]  ;;  %v645_v40 = vmul.f32 %v1339_v1, %v387_v37 }
  0xac   : > { %879 = vst [vmem:[%s1355_s20 + $0x5c0] sm:$0xff] %v622_v56  ;;  %880 = vst [vmem:[%s1355_s20 + $0x5c8] sm:$0xff] %v623_v57  ;;  %v646_v41 = vmul.f32 %v1339_v1, %v388_v38  ;;  %v647_v42 = vmul.f32 %v1339_v1, %v389_v39  ;;  %v390_v43 = vld [vmem:[%s1332_s8 + $0x690] sm:$0xff]  ;;  %v391_v44 = vld [vmem:[%s1332_s8 + $0x698] sm:$0xff] }
  0xad   : > { %881 = vst [vmem:[%s1355_s20 + $0x5d0] sm:$0xff] %v624_v61  ;;  %882 = vst [vmem:[%s1355_s20 + $0x5d8] sm:$0xff] %v625_v62  ;;  %v392_v45 = vld [vmem:[%s1332_s8 + $0x6a0] sm:$0xff]  ;;  %v648_v46 = vmul.f32 %v1339_v1, %v390_v43  ;;  %v649_v47 = vmul.f32 %v1339_v1, %v391_v44  ;;  %v393_v49 = vld [vmem:[%s1332_s8 + $0x6a8] sm:$0xff] }
  0xae   : > { %883 = vst [vmem:[%s1355_s20 + $0x5e0] sm:$0xff] %v626_v63  ;;  %884 = vst [vmem:[%s1355_s20 + $0x5e8] sm:$0xff] %v627_v4  ;;  %v650_v48 = vmul.f32 %v1339_v1, %v392_v45  ;;  %v394_v50 = vld [vmem:[%s1332_s8 + $0x6b0] sm:$0xff]  ;;  %v395_v51 = vld [vmem:[%s1332_s8 + $0x6b8] sm:$0xff]  ;;  %v651_v52 = vmul.f32 %v1339_v1, %v393_v49 }
  0xaf   : > { %885 = vst [vmem:[%s1355_s20 + $0x5f0] sm:$0xff] %v628_v5  ;;  %886 = vst [vmem:[%s1355_s20 + $0x5f8] sm:$0xff] %v629_v6  ;;  %v652_v53 = vmul.f32 %v1339_v1, %v394_v50  ;;  %v653_v54 = vmul.f32 %v1339_v1, %v395_v51  ;;  %v396_v55 = vld [vmem:[%s1332_s8 + $0x6c0] sm:$0xff]  ;;  %v397_v56 = vld [vmem:[%s1332_s8 + $0x6c8] sm:$0xff] }
  0xb0   : > { %887 = vst [vmem:[%s1355_s20 + $0x600] sm:$0xff] %v630_v10  ;;  %888 = vst [vmem:[%s1355_s20 + $0x608] sm:$0xff] %v631_v11  ;;  %v398_v57 = vld [vmem:[%s1332_s8 + $0x6d0] sm:$0xff]  ;;  %v654_v58 = vmul.f32 %v1339_v1, %v396_v55  ;;  %v655_v59 = vmul.f32 %v1339_v1, %v397_v56  ;;  %v399_v61 = vld [vmem:[%s1332_s8 + $0x6d8] sm:$0xff] }
  0xb1   : > { %889 = vst [vmem:[%s1355_s20 + $0x610] sm:$0xff] %v632_v12  ;;  %890 = vst [vmem:[%s1355_s20 + $0x618] sm:$0xff] %v633_v16  ;;  %v656_v60 = vmul.f32 %v1339_v1, %v398_v57  ;;  %v400_v62 = vld [vmem:[%s1332_s8 + $0x6e0] sm:$0xff]  ;;  %v401_v63 = vld [vmem:[%s1332_s8 + $0x6e8] sm:$0xff]  ;;  %v657_v0 = vmul.f32 %v1339_v1, %v399_v61 }
  0xb2   : > { %891 = vst [vmem:[%s1355_s20 + $0x620] sm:$0xff] %v634_v17  ;;  %892 = vst [vmem:[%s1355_s20 + $0x628] sm:$0xff] %v635_v18  ;;  %v658_v2 = vmul.f32 %v1339_v1, %v400_v62  ;;  %v659_v3 = vmul.f32 %v1339_v1, %v401_v63  ;;  %v402_v4 = vld [vmem:[%s1332_s8 + $0x6f0] sm:$0xff]  ;;  %v403_v5 = vld [vmem:[%s1332_s8 + $0x6f8] sm:$0xff] }
  0xb3   : > { %893 = vst [vmem:[%s1355_s20 + $0x630] sm:$0xff] %v636_v22  ;;  %894 = vst [vmem:[%s1355_s20 + $0x638] sm:$0xff] %v637_v23  ;;  %v404_v6 = vld [vmem:[%s1332_s8 + $0x700] sm:$0xff]  ;;  %v660_v7 = vmul.f32 %v1339_v1, %v402_v4  ;;  %v661_v8 = vmul.f32 %v1339_v1, %v403_v5  ;;  %v405_v10 = vld [vmem:[%s1332_s8 + $0x708] sm:$0xff] }
  0xb4   : > { %895 = vst [vmem:[%s1355_s20 + $0x640] sm:$0xff] %v638_v24  ;;  %896 = vst [vmem:[%s1355_s20 + $0x648] sm:$0xff] %v639_v28  ;;  %v662_v9 = vmul.f32 %v1339_v1, %v404_v6  ;;  %v406_v11 = vld [vmem:[%s1332_s8 + $0x710] sm:$0xff]  ;;  %v407_v12 = vld [vmem:[%s1332_s8 + $0x718] sm:$0xff]  ;;  %v663_v13 = vmul.f32 %v1339_v1, %v405_v10 }
  0xb5   : > { %897 = vst [vmem:[%s1355_s20 + $0x650] sm:$0xff] %v640_v29  ;;  %898 = vst [vmem:[%s1355_s20 + $0x658] sm:$0xff] %v641_v30  ;;  %v664_v14 = vmul.f32 %v1339_v1, %v406_v11  ;;  %v665_v15 = vmul.f32 %v1339_v1, %v407_v12  ;;  %v408_v16 = vld [vmem:[%s1332_s8 + $0x720] sm:$0xff]  ;;  %v409_v17 = vld [vmem:[%s1332_s8 + $0x728] sm:$0xff] }
  0xb6   : > { %899 = vst [vmem:[%s1355_s20 + $0x660] sm:$0xff] %v642_v34  ;;  %900 = vst [vmem:[%s1355_s20 + $0x668] sm:$0xff] %v643_v35  ;;  %v410_v18 = vld [vmem:[%s1332_s8 + $0x730] sm:$0xff]  ;;  %v666_v19 = vmul.f32 %v1339_v1, %v408_v16  ;;  %v667_v20 = vmul.f32 %v1339_v1, %v409_v17  ;;  %v411_v22 = vld [vmem:[%s1332_s8 + $0x738] sm:$0xff] }
  0xb7   : > { %901 = vst [vmem:[%s1355_s20 + $0x670] sm:$0xff] %v644_v36  ;;  %902 = vst [vmem:[%s1355_s20 + $0x678] sm:$0xff] %v645_v40  ;;  %v668_v21 = vmul.f32 %v1339_v1, %v410_v18  ;;  %v412_v23 = vld [vmem:[%s1332_s8 + $0x740] sm:$0xff]  ;;  %v413_v24 = vld [vmem:[%s1332_s8 + $0x748] sm:$0xff]  ;;  %v669_v25 = vmul.f32 %v1339_v1, %v411_v22 }
  0xb8   : > { %903 = vst [vmem:[%s1355_s20 + $0x680] sm:$0xff] %v646_v41  ;;  %904 = vst [vmem:[%s1355_s20 + $0x688] sm:$0xff] %v647_v42  ;;  %v670_v26 = vmul.f32 %v1339_v1, %v412_v23  ;;  %v671_v27 = vmul.f32 %v1339_v1, %v413_v24  ;;  %v414_v28 = vld [vmem:[%s1332_s8 + $0x750] sm:$0xff]  ;;  %v415_v29 = vld [vmem:[%s1332_s8 + $0x758] sm:$0xff] }
  0xb9   : > { %905 = vst [vmem:[%s1355_s20 + $0x690] sm:$0xff] %v648_v46  ;;  %906 = vst [vmem:[%s1355_s20 + $0x698] sm:$0xff] %v649_v47  ;;  %v416_v30 = vld [vmem:[%s1332_s8 + $0x760] sm:$0xff]  ;;  %v672_v31 = vmul.f32 %v1339_v1, %v414_v28  ;;  %v673_v32 = vmul.f32 %v1339_v1, %v415_v29  ;;  %v417_v34 = vld [vmem:[%s1332_s8 + $0x768] sm:$0xff] }
  0xba   : > { %907 = vst [vmem:[%s1355_s20 + $0x6a0] sm:$0xff] %v650_v48  ;;  %908 = vst [vmem:[%s1355_s20 + $0x6a8] sm:$0xff] %v651_v52  ;;  %v674_v33 = vmul.f32 %v1339_v1, %v416_v30  ;;  %v418_v35 = vld [vmem:[%s1332_s8 + $0x770] sm:$0xff]  ;;  %v419_v36 = vld [vmem:[%s1332_s8 + $0x778] sm:$0xff]  ;;  %v675_v37 = vmul.f32 %v1339_v1, %v417_v34 }
  0xbb   : > { %909 = vst [vmem:[%s1355_s20 + $0x6b0] sm:$0xff] %v652_v53  ;;  %910 = vst [vmem:[%s1355_s20 + $0x6b8] sm:$0xff] %v653_v54  ;;  %v676_v38 = vmul.f32 %v1339_v1, %v418_v35  ;;  %v677_v39 = vmul.f32 %v1339_v1, %v419_v36  ;;  %v420_v40 = vld [vmem:[%s1332_s8 + $0x780] sm:$0xff]  ;;  %v421_v41 = vld [vmem:[%s1332_s8 + $0x788] sm:$0xff] }
  0xbc   : > { %911 = vst [vmem:[%s1355_s20 + $0x6c0] sm:$0xff] %v654_v58  ;;  %912 = vst [vmem:[%s1355_s20 + $0x6c8] sm:$0xff] %v655_v59  ;;  %v422_v42 = vld [vmem:[%s1332_s8 + $0x790] sm:$0xff]  ;;  %v678_v43 = vmul.f32 %v1339_v1, %v420_v40  ;;  %v679_v44 = vmul.f32 %v1339_v1, %v421_v41  ;;  %v423_v46 = vld [vmem:[%s1332_s8 + $0x798] sm:$0xff] }
  0xbd   : > { %913 = vst [vmem:[%s1355_s20 + $0x6d0] sm:$0xff] %v656_v60  ;;  %914 = vst [vmem:[%s1355_s20 + $0x6d8] sm:$0xff] %v657_v0  ;;  %v680_v45 = vmul.f32 %v1339_v1, %v422_v42  ;;  %v424_v47 = vld [vmem:[%s1332_s8 + $0x7a0] sm:$0xff]  ;;  %v425_v48 = vld [vmem:[%s1332_s8 + $0x7a8] sm:$0xff]  ;;  %v681_v49 = vmul.f32 %v1339_v1, %v423_v46 }
  0xbe   : > { %915 = vst [vmem:[%s1355_s20 + $0x6e0] sm:$0xff] %v658_v2  ;;  %916 = vst [vmem:[%s1355_s20 + $0x6e8] sm:$0xff] %v659_v3  ;;  %v682_v50 = vmul.f32 %v1339_v1, %v424_v47  ;;  %v683_v51 = vmul.f32 %v1339_v1, %v425_v48  ;;  %v426_v52 = vld [vmem:[%s1332_s8 + $0x7b0] sm:$0xff]  ;;  %v427_v53 = vld [vmem:[%s1332_s8 + $0x7b8] sm:$0xff] }
  0xbf   : > { %917 = vst [vmem:[%s1355_s20 + $0x6f0] sm:$0xff] %v660_v7  ;;  %918 = vst [vmem:[%s1355_s20 + $0x6f8] sm:$0xff] %v661_v8  ;;  %v428_v54 = vld [vmem:[%s1332_s8 + $0x7c0] sm:$0xff]  ;;  %v684_v55 = vmul.f32 %v1339_v1, %v426_v52  ;;  %v685_v56 = vmul.f32 %v1339_v1, %v427_v53  ;;  %v429_v58 = vld [vmem:[%s1332_s8 + $0x7c8] sm:$0xff] }
  0xc0   : > { %919 = vst [vmem:[%s1355_s20 + $0x700] sm:$0xff] %v662_v9  ;;  %920 = vst [vmem:[%s1355_s20 + $0x708] sm:$0xff] %v663_v13  ;;  %v686_v57 = vmul.f32 %v1339_v1, %v428_v54  ;;  %v430_v59 = vld [vmem:[%s1332_s8 + $0x7d0] sm:$0xff]  ;;  %v431_v60 = vld [vmem:[%s1332_s8 + $0x7d8] sm:$0xff]  ;;  %v687_v61 = vmul.f32 %v1339_v1, %v429_v58 }
  0xc1   : > { %921 = vst [vmem:[%s1355_s20 + $0x710] sm:$0xff] %v664_v14  ;;  %922 = vst [vmem:[%s1355_s20 + $0x718] sm:$0xff] %v665_v15  ;;  %v688_v62 = vmul.f32 %v1339_v1, %v430_v59  ;;  %v689_v63 = vmul.f32 %v1339_v1, %v431_v60  ;;  %v432_v0 = vld [vmem:[%s1332_s8 + $0x7e0] sm:$0xff]  ;;  %v433_v2 = vld [vmem:[%s1332_s8 + $0x7e8] sm:$0xff] }
  0xc2   : > { %923 = vst [vmem:[%s1355_s20 + $0x720] sm:$0xff] %v666_v19  ;;  %924 = vst [vmem:[%s1355_s20 + $0x728] sm:$0xff] %v667_v20  ;;  %v434_v3 = vld [vmem:[%s1332_s8 + $0x7f0] sm:$0xff]  ;;  %v690_v4 = vmul.f32 %v1339_v1, %v432_v0  ;;  %v691_v5 = vmul.f32 %v1339_v1, %v433_v2  ;;  %v435_v7 = vld [vmem:[%s1332_s8 + $0x7f8] sm:$0xff] }
  0xc3   : > { %925 = vst [vmem:[%s1355_s20 + $0x730] sm:$0xff] %v668_v21  ;;  %926 = vst [vmem:[%s1355_s20 + $0x738] sm:$0xff] %v669_v25  ;;  %v692_v6 = vmul.f32 %v1339_v1, %v434_v3  ;;  %v436_v8 = vld [vmem:[%s1332_s8 + $0x800] sm:$0xff]  ;;  %v693_v9 = vmul.f32 %v1339_v1, %v435_v7 }
  0xc4   : > { %927 = vst [vmem:[%s1355_s20 + $0x740] sm:$0xff] %v670_v26  ;;  %928 = vst [vmem:[%s1355_s20 + $0x748] sm:$0xff] %v671_v27  ;;  %v694_v10 = vmul.f32 %v1339_v1, %v436_v8 }
  0xc5   : > { %929 = vst [vmem:[%s1355_s20 + $0x750] sm:$0xff] %v672_v31  ;;  %930 = vst [vmem:[%s1355_s20 + $0x758] sm:$0xff] %v673_v32 }
  0xc6   : > { %931 = vst [vmem:[%s1355_s20 + $0x760] sm:$0xff] %v674_v33  ;;  %932 = vst [vmem:[%s1355_s20 + $0x768] sm:$0xff] %v675_v37 }
  0xc7   : > { %933 = vst [vmem:[%s1355_s20 + $0x770] sm:$0xff] %v676_v38  ;;  %934 = vst [vmem:[%s1355_s20 + $0x778] sm:$0xff] %v677_v39 }
  0xc8   : > { %935 = vst [vmem:[%s1355_s20 + $0x780] sm:$0xff] %v678_v43  ;;  %936 = vst [vmem:[%s1355_s20 + $0x788] sm:$0xff] %v679_v44 }
  0xc9   : > { %937 = vst [vmem:[%s1355_s20 + $0x790] sm:$0xff] %v680_v45  ;;  %938 = vst [vmem:[%s1355_s20 + $0x798] sm:$0xff] %v681_v49 }
  0xca   : > { %939 = vst [vmem:[%s1355_s20 + $0x7a0] sm:$0xff] %v682_v50  ;;  %940 = vst [vmem:[%s1355_s20 + $0x7a8] sm:$0xff] %v683_v51  ;;  %959 = sbr.rel (!%p1272_p9) target bundleno = 237 (0xed), region = 36 }
  0xcb   : > { %941 = vst [vmem:[%s1355_s20 + $0x7b0] sm:$0xff] %v684_v55  ;;  %942 = vst [vmem:[%s1355_s20 + $0x7b8] sm:$0xff] %v685_v56 }
  0xcc   : > { %943 = vst [vmem:[%s1355_s20 + $0x7c0] sm:$0xff] %v686_v57  ;;  %944 = vst [vmem:[%s1355_s20 + $0x7c8] sm:$0xff] %v687_v61 }
  0xcd   : > { %945 = vst [vmem:[%s1355_s20 + $0x7d0] sm:$0xff] %v688_v62  ;;  %946 = vst [vmem:[%s1355_s20 + $0x7d8] sm:$0xff] %v689_v63 }
  0xce   : > { %947 = vst [vmem:[%s1355_s20 + $0x7e0] sm:$0xff] %v690_v4  ;;  %948 = vst [vmem:[%s1355_s20 + $0x7e8] sm:$0xff] %v691_v5 }
  0xcf   : > { %949 = vst [vmem:[%s1355_s20 + $0x7f0] sm:$0xff] %v692_v6  ;;  %950 = vst [vmem:[%s1355_s20 + $0x7f8] sm:$0xff] %v693_v9 }
  0xd0   : > { %951 = vst [vmem:[%s1355_s20 + $0x800] sm:$0xff] %v694_v10 }
  0xd1   : > { %s2192_s7 = smov (!%p962_p6, %s961_s7), 257 }
  0xd2   : > { %s2117_s9 = sshll.u32 %s2192_s7, 7 }
  0xd3   : > { %s966_s10 = ssub.s32 32896, %s2117_s9 }
  0xd4   : > { %967 = vsyncadd %s953_s29, %s966_s10  ;;  %p1055_p10 = scmp.ne.s32.totalorder %s2117_s9, 0  ;;  %s1062_s21 = smul.u32 32896, %s1249_s0 }
  0xd5   : > { %s972_s15 = sshll.u32 %s1355_s20, 4  ;;  %s1207_s25 = smov [#allocation6]   ;;  %s2130_s15 = int_to_ptr.vmem [resolvable:$true] %s972_s15 }
  0xd6   : > { %s2128_s23 = scalar_lea.hbm %s2178_s2, %s1062_s21  ;;  %s1136_s24 = scalar_lea.vmem %s2130_s15, %s2117_s9 }
  0xd7   : > { %p1137_p9 = scmp.ne.s32.totalorder %s2130_s15, %s1136_s24  ;;  %s1140_s26 = sshll.u32 %s1207_s25, 4  ;;  %s1141_s26 = int_to_ptr.vmem [resolvable:$false] %s1140_s26 }
  0xd8   : > { %s1142_s0 = scalar_lea.vmem %s1141_s26, 65792  ;;  %p1143_p12 = scmp.lt.s32.totalorder %s2130_s15, %s1141_s26 }
  0xd9   : > { %p1138_p11 = pnand %p1137_p9, %p1055_p10  ;;  %p1144_p0 = scmp.lt.s32.totalorder %s1142_s0, %s1136_s24 }
  0xdb   : > { %p1139_p13 = pneg %p1138_p11  ;;  %p1145_p1 = por %p1144_p0, %p1143_p12 }
  0xdd   : > { %p1146_p3 = pnand %p1145_p1, %p1139_p13 }
  0xdf   : > { %1149 = shalt.err (!%p1146_p3)
}
  0xe0   : > { %s1150_s28 = scalar_lea.hbm %s2128_s23, %s2117_s9  ;;  %s1154_s6 = scalar_lea.hbm %s2178_s2, 65664 }
  0xe1   : > { %p1151_p4 = scmp.ne.s32.totalorder %s2128_s23, %s1150_s28  ;;  %p1155_p7 = scmp.lt.u32.totalorder %s2128_s23, %s2178_s2 }
  0xe2   : > { %p1156_p8 = scmp.lt.u32.totalorder %s1154_s6, %s1150_s28  ;;  %p1158_p9 = scmp.lt.u32.totalorder %s1150_s28, %s2128_s23 }
  0xe3   : > { %p1152_p5 = pnand %p1151_p4, %p1055_p10 }
  0xe4   : > { %p1157_p6 = por %p1156_p8, %p1155_p7 }
  0xe5   : > { %p1153_p2 = pneg %p1152_p5 }
  0xe6   : > { %p1159_p11 = por %p1158_p9, %p1157_p6 }
  0xe8   : > { %p1160_p13 = pnand %p1159_p11, %p1153_p2 }
  0xea   : > { %1163 = shalt.err (!%p1160_p13)
}
  0xeb   : > { %s1208_s20 = smov 128   ;;  %s1209_s4 = smov 8  }
  0xec   : > { %978 = dma.vmem_to_hbm [thread:$0]  (%p1055_p10), %s2130_s15, %s2117_s9, %s2128_s23, %s953_s29, %s1208_s20, %s1208_s20, %s1209_s4  }
  0xed PF: > { %s987_s7 = sand.u32 1, %s1190_s11   ;;  %p2183_p12 = scmp.ne.s32.totalorder %s2182_s22, 0 }
  0xee   : > { %p2184_p0 = scmp.ge.s32.totalorder %s1202_s14, 2  ;;  %s988_s10 = scalar_lea.sflag [#allocation5], %s987_s7 }
  0xf0   : > { %p1068_p1 = pnand %p2184_p0, %p2183_p12 }
  0xf2   : > { %1185 = dma.done.wait (!%p1068_p1), %s988_s10, 32896  }
  0xf3   : > { %1187 = vsyncadd (!%p1068_p1), %s988_s10, 4294934400  ;;  %p16_p3 = scmp.ge.s32.totalorder %s1253_s16, 4   ;;  %s2185_s11 = smov %s1194_s12 }
  0xf4   : > { %s2186_s12 = smov %s1198_s13  ;;  %s2187_s13 = smov %s1265_s19 }
  0xf5   : > { %s2188_s14 = smov %s1253_s16  ;;  %18 = sbr.rel (!%p16_p3) target bundleno = 7 (0x7), region = 73 }
  0xfc   :  { %993 = vsyncpa [#allocation4], 1 }
  0xfd   :  { %995 = vsyncpa [#allocation4 + $0x1], 1 }
  0xfe   :  { %996 = vsyncpa [#allocation5], 1 }
  0xff   :  { %998 = vsyncpa [#allocation5 + $0x1], 1 }

</bundles_post_ra>
